<compile_context>
chip_gen: v7x
topology: tpu7x:2x2x1
jax: 0.10.0
libtpu: 0.0.40
codegen_flags: <defaults>
</compile_context>

<pallas_src>
import jax
import jax.numpy as jnp
from jax.experimental import pallas as pl
from jax.experimental.pallas import tpu as pltpu

# ----------------------------- configuration ------------------------------
DIM = 7          # 3 xyz coords + 4 extra feats (tuple input branch of forward)
C_DIM = 32       # latent code dim (concat_feat=False, so planes are summed)
HIDDEN = 32      # hidden_size
N_BLOCKS = 5     # number of ResnetBlockFC blocks
OUT_DIM = 1
PADDING = 0.1

FUSED_IN = DIM + C_DIM                  # 39  ([f | c] input width per point)

F_FOLD = 4                              # points folded per kernel row
FUSED_IN_F = FUSED_IN * F_FOLD          # 156 (folded input width)
HID_F = HIDDEN * F_FOLD                 # 128 (folded hidden width, lane-dense)
PROJ_OUT_F = HID_F * (1 + N_BLOCKS)     # 768 (folded fused projection width)
ROW_PTS = 8 * F_FOLD                    # 32 points per 8 folded sublanes


# ------------------------- coordinate normalization -----------------------
def normalize_coordinate(p, plane, padding=PADDING):
    # ConvONet normalize_coordinate semantics (10e-4 / 10e-6 literals kept).
    if plane == 'xz':
        idx = (0, 2)
    elif plane == 'xy':
        idx = (0, 1)
    else:  # 'yz'
        idx = (1, 2)
    xy = jnp.stack([p[..., idx[0]], p[..., idx[1]]], axis=-1)
    xy = xy / (1.0 + padding + 10e-4) + 0.5
    xy = jnp.where(xy >= 1.0, 1.0 - 10e-6, xy)
    xy = jnp.where(xy < 0.0, 0.0, xy)
    return xy  # (B, T, 2)


# ------------------- grid_sample (bilinear, border, align) ----------------
# TODO(synk): the data-dependent bilinear gather of F.grid_sample stays as XLA
# glue; only the MLP hot path runs in the Pallas kernel below.
def grid_sample_2d(c, grid):
    """c: (B, C, H, W); grid: (B, T, 2) with (x, y) in [-1, 1].
    Matches torch grid_sample(mode='bilinear', padding_mode='border',
    align_corners=True). Returns (B, C, T)."""
    B, C, H, W = c.shape
    x = grid[..., 0]
    y = grid[..., 1]
    ix = jnp.clip((x + 1.0) * 0.5 * (W - 1), 0.0, float(W - 1))
    iy = jnp.clip((y + 1.0) * 0.5 * (H - 1), 0.0, float(H - 1))
    ix0f = jnp.floor(ix)
    iy0f = jnp.floor(iy)
    wx1 = ix - ix0f
    wy1 = iy - iy0f
    wx0 = 1.0 - wx1
    wy0 = 1.0 - wy1
    ix0 = ix0f.astype(jnp.int32)
    iy0 = iy0f.astype(jnp.int32)
    ix1 = jnp.clip(ix0 + 1, 0, W - 1)
    iy1 = jnp.clip(iy0 + 1, 0, H - 1)

    def gather(cb, iyb, ixb):  # cb: (C,H,W); iyb, ixb: (T,)
        return cb[:, iyb, ixb]  # (C, T)

    v00 = jax.vmap(gather)(c, iy0, ix0)
    v01 = jax.vmap(gather)(c, iy0, ix1)
    v10 = jax.vmap(gather)(c, iy1, ix0)
    v11 = jax.vmap(gather)(c, iy1, ix1)
    w00 = (wy0 * wx0)[:, None, :]
    w01 = (wy0 * wx1)[:, None, :]
    w10 = (wy1 * wx0)[:, None, :]
    w11 = (wy1 * wx1)[:, None, :]
    return v00 * w00 + v01 * w01 + v10 * w10 + v11 * w11


def sample_plane_feature(p, c_plane, plane):
    xy = normalize_coordinate(p, plane=plane)     # (B, T, 2) in (0, 1)
    vgrid = 2.0 * xy - 1.0                        # (B, T, 2) in (-1, 1)
    return grid_sample_2d(c_plane, vgrid)         # (B, C, T)


# ------------------------------ Pallas kernel ------------------------------
def _decoder_mlp_kernel(x_ref, w_in_ref, b_in_ref,
                        w0_ref, b0_ref, w1_ref, b1_ref,
                        wo_ref, bo_ref, out_ref):
    x = x_ref[...]                                           # (rows, 156) bf16
    # Fused fc_p(f) + all five fc_c(c) projections, folded 4 points per row:
    # one (rows,156)@(156,768) MXU matmul; columns grouped in 128-wide slabs.
    proj = jnp.dot(x, w_in_ref[...],
                   preferred_element_type=jnp.float32) + b_in_ref[...]
    net = proj[:, :HID_F]                                    # fc_p(f) + bp
    for i in range(N_BLOCKS):                                # fully unrolled
        # net = net + fc_c[i](c)   (precomputed 128-wide slab of proj)
        net = net + proj[:, HID_F * (i + 1):HID_F * (i + 2)]
        # ResnetBlockFC: x + fc_1(relu(fc_0(relu(x)))) with block-diag weights
        h = jnp.maximum(net, 0.0)
        h = jnp.dot(h.astype(jnp.bfloat16), w0_ref[i],
                    preferred_element_type=jnp.float32) + b0_ref[i]
        h = jnp.maximum(h, 0.0)
        dx = jnp.dot(h.astype(jnp.bfloat16), w1_ref[i],
                     preferred_element_type=jnp.float32) + b1_ref[i]
        net = net + dx
    # fc_out: block-diagonal (128, 4) selection matmul -> folded (rows, 4) out.
    h = jnp.maximum(net, 0.0)
    out = jnp.dot(h.astype(jnp.bfloat16), wo_ref[...],
                  preferred_element_type=jnp.float32) + bo_ref[...]
    out_ref[...] = out


def _round_up(n, m):
    return ((n + m - 1) // m) * m


def _whole_spec(x):
    nd = x.ndim
    return pl.BlockSpec(x.shape, lambda i, _nd=nd: (0,) * _nd)


def _block_diag(w, fold):
    n, m = w.shape
    out = jnp.zeros((n * fold, m * fold), w.dtype)
    for j in range(fold):
        out = out.at[n * j:n * (j + 1), m * j:m * (j + 1)].set(w)
    return out


def prepare_decoder_params(params, fold=F_FOLD):
    """Fold `fold` points per row: fuse fc_p + the five loop-invariant fc_c
    projections into one block-diagonal weight with lane-aligned 32*fold-wide
    column groups, replicate all per-block weights block-diagonally, tile the
    biases, and pre-cast matmul operands to bf16 (biases stay f32)."""
    # Fused input projection (39*fold, 192*fold); column groups:
    #   group 0      : fc_p outputs for points 0..fold-1   (cols 0..32*fold)
    #   group i + 1  : fc_c[i] outputs for points 0..fold-1
    w_in = jnp.zeros((FUSED_IN * fold, HIDDEN * fold * (1 + N_BLOCKS)),
                     jnp.float32)
    for j in range(fold):
        r0 = FUSED_IN * j
        cp = HIDDEN * j
        w_in = w_in.at[r0:r0 + DIM, cp:cp + HIDDEN].set(params['wp'])
        for i in range(N_BLOCKS):
            cg = HIDDEN * fold * (i + 1) + HIDDEN * j
            w_in = w_in.at[r0 + DIM:r0 + FUSED_IN,
                           cg:cg + HIDDEN].set(params['wc'][i])
    b_in = jnp.concatenate(
        [jnp.tile(params['bp'], (1, fold))] +
        [jnp.tile(params['bc'][i], (1, fold)) for i in range(N_BLOCKS)],
        axis=1)                                              # (1, 192*fold)

    w0 = jnp.stack([_block_diag(params['w0'][i], fold) for i in range(N_BLOCKS)])
    w1 = jnp.stack([_block_diag(params['w1'][i], fold) for i in range(N_BLOCKS)])
    b0 = jnp.stack([jnp.tile(params['b0'][i], (1, fold)) for i in range(N_BLOCKS)])
    b1 = jnp.stack([jnp.tile(params['b1'][i], (1, fold)) for i in range(N_BLOCKS)])

    # fc_out selection matrix: (32*fold, fold), block-diagonal copies of wo.
    wo = jnp.zeros((HIDDEN * fold, fold), jnp.float32)
    for j in range(fold):
        wo = wo.at[HIDDEN * j:HIDDEN * (j + 1), j].set(params['wo'][:, 0])
    bo = jnp.tile(params['bo'].reshape(1, 1), (1, fold))

    return dict(
        w_in=w_in.astype(jnp.bfloat16),   # (156, 768)
        b_in=b_in.astype(jnp.float32),    # (1, 768)
        w0=w0.astype(jnp.bfloat16),       # (5, 128, 128)
        b0=b0.astype(jnp.float32),        # (5, 1, 128)
        w1=w1.astype(jnp.bfloat16),       # (5, 128, 128)
        b1=b1.astype(jnp.float32),        # (5, 1, 128)
        wo=wo.astype(jnp.bfloat16),       # (128, 4)
        bo=bo.astype(jnp.float32),        # (1, 4)
    )


def pallas_decoder_mlp(f2, c2, fused, tile_n=8192):
    """f2: (N, DIM) f32, c2: (N, C_DIM) f32 -> (N, OUT_DIM) f32."""
    N = f2.shape[0]
    # One fused bf16 input stream: [f | c] -> (N, 39).
    x = jnp.concatenate([f2, c2], axis=1).astype(jnp.bfloat16)

    # Tile size in *points*: large (per-grid-step overhead ~0.35 us), multiple
    # of ROW_PTS (= 8 folded sublanes), padded so the grid divides exactly.
    tile = min(int(tile_n), _round_up(N, ROW_PTS))
    tile = max(ROW_PTS, _round_up(tile, ROW_PTS))
    # v7x megacore: keep the grid at >= 2 steps when N allows so the
    # "parallel" grid axis can be sharded across both TensorCores.
    if _round_up(N, tile) // tile < 2 and N > ROW_PTS:
        tile = max(ROW_PTS, _round_up(-(-N // 2), ROW_PTS))

    n_pad = _round_up(N, tile)
    if n_pad != N:
        x = jnp.pad(x, ((0, n_pad - N), (0, 0)))

    # Fold F_FOLD consecutive points per row (free row-major view).
    rows = n_pad // F_FOLD
    tile_rows = tile // F_FOLD
    x = x.reshape(rows, FUSED_IN_F)

    weights = [fused['w_in'], fused['b_in'], fused['w0'], fused['b0'],
               fused['w1'], fused['b1'], fused['wo'], fused['bo']]
    in_specs = [pl.BlockSpec((tile_rows, FUSED_IN_F), lambda i: (i, 0))] + \
               [_whole_spec(w) for w in weights]
    out_spec = pl.BlockSpec((tile_rows, F_FOLD), lambda i: (i, 0))

    out = pl.pallas_call(
        _decoder_mlp_kernel,
        out_shape=jax.ShapeDtypeStruct((rows, F_FOLD), jnp.float32),
        grid=(rows // tile_rows,),
        in_specs=in_specs,
        out_specs=out_spec,
        compiler_params=pltpu.CompilerParams(
            dimension_semantics=("parallel",),
            # Explicit limit so v5e's 16 MiB default scoped VMEM does not cap
            # the tile; well under v7x's 64 MiB physical VMEM.
            vmem_limit_bytes=40 * 1024 * 1024),
    )(x, *weights)

    # Unfold (rows, F) -> (n_pad, 1); drop padded tail rows.
    return out.reshape(n_pad, OUT_DIM)[:N]


# ------------------------------ forward glue -------------------------------
def local_decoder_forward(p, r, c_planes, params, tile_n=8192):
    """p: (B, T, 3), r: (B, T, 4), c_planes: dict of (B, C_DIM, H, W)."""
    p = p.astype(jnp.float32)
    r = r.astype(jnp.float32)
    f = jnp.concatenate([p, r], axis=2)                  # (B, T, 7)
    zero_point_indices = (p.sum(axis=2) == 0)            # (B, T)

    c = 0.0
    for plane in ('xz', 'xy', 'yz'):
        if plane in c_planes:
            c = c + sample_plane_feature(p, c_planes[plane], plane)  # (B, C, T)
    c = jnp.swapaxes(c, 1, 2)                            # (B, T, C)
    c = jnp.where(zero_point_indices[..., None], 0.0, c)

    B, T, _ = f.shape
    fused = prepare_decoder_params(params)
    out = pallas_decoder_mlp(f.reshape(B * T, DIM),
                             c.reshape(B * T, C_DIM),
                             fused, tile_n=tile_n)       # (B*T, 1)
    return out.reshape(B, T)                             # out.squeeze(-1)


# ---------------------------- pure-JAX references ---------------------------
def reference_mlp_f32(f2, c2, params):
    net = f2 @ params['wp'] + params['bp']
    for i in range(N_BLOCKS):
        net = net + c2 @ params['wc'][i] + params['bc'][i]
        h = jnp.maximum(net, 0.0)
        h = jnp.maximum(h @ params['w0'][i] + params['b0'][i], 0.0)
        dx = h @ params['w1'][i] + params['b1'][i]
        net = net + dx
    return jnp.maximum(net, 0.0) @ params['wo'] + params['bo']


def reference_mlp_bf16(f2, c2, params):
    """Mimics the kernel's numerics: bf16 matmul operands, f32 accumulation."""
    bf = jnp.bfloat16
    net = jnp.dot(f2.astype(bf), params['wp'].astype(bf),
                  preferred_element_type=jnp.float32) + params['bp']
    for i in range(N_BLOCKS):
        net = net + jnp.dot(c2.astype(bf), params['wc'][i].astype(bf),
                            preferred_element_type=jnp.float32) + params['bc'][i]
        h = jnp.maximum(net, 0.0)
        h = jnp.maximum(jnp.dot(h.astype(bf), params['w0'][i].astype(bf),
                                preferred_element_type=jnp.float32)
                        + params['b0'][i], 0.0)
        dx = jnp.dot(h.astype(bf), params['w1'][i].astype(bf),
                     preferred_element_type=jnp.float32) + params['b1'][i]
        net = net + dx
    h = jnp.maximum(net, 0.0)
    return jnp.dot(h.astype(bf), params['wo'].astype(bf),
                   preferred_element_type=jnp.float32) + params['bo']


def reference_forward(p, r, c_planes, params, mlp=reference_mlp_f32):
    p = p.astype(jnp.float32)
    r = r.astype(jnp.float32)
    f = jnp.concatenate([p, r], axis=2)
    zero_mask = (p.sum(axis=2) == 0)
    c = 0.0
    for plane in ('xz', 'xy', 'yz'):
        c = c + sample_plane_feature(p, c_planes[plane], plane)
    c = jnp.swapaxes(c, 1, 2)
    c = jnp.where(zero_mask[..., None], 0.0, c)
    B, T, _ = f.shape
    f2 = f.astype(jnp.bfloat16).astype(jnp.float32)   # match kernel input cast
    c2 = c
    if mlp is reference_mlp_bf16:
        c2 = c.astype(jnp.bfloat16).astype(jnp.float32)
    out = mlp(f2.reshape(B * T, DIM), c2.reshape(B * T, C_DIM), params)
    return out.reshape(B, T)


# ------------------------------- params init --------------------------------
def init_params(key):
    ks = jax.random.split(key, 12)
    s = 0.1
    return {
        'wp': s * jax.random.normal(ks[0], (DIM, HIDDEN), jnp.float32),
        'bp': s * jax.random.normal(ks[1], (1, HIDDEN), jnp.float32),
        'wc': s * jax.random.normal(ks[2], (N_BLOCKS, C_DIM, HIDDEN), jnp.float32),
        'bc': s * jax.random.normal(ks[3], (N_BLOCKS, 1, HIDDEN), jnp.float32),
        'w0': s * jax.random.normal(ks[4], (N_BLOCKS, HIDDEN, HIDDEN), jnp.float32),
        'b0': s * jax.random.normal(ks[5], (N_BLOCKS, 1, HIDDEN), jnp.float32),
        'w1': s * jax.random.normal(ks[6], (N_BLOCKS, HIDDEN, HIDDEN), jnp.float32),
        'b1': s * jax.random.normal(ks[7], (N_BLOCKS, 1, HIDDEN), jnp.float32),
        'wo': s * jax.random.normal(ks[8], (HIDDEN, OUT_DIM), jnp.float32),
        'bo': s * jax.random.normal(ks[9], (1, OUT_DIM), jnp.float32),
    }


# ----------------------------------- main ------------------------------------
if __name__ == "__main__":
    key = jax.random.PRNGKey(0)
    k = jax.random.split(key, 8)
    B, T, RES = 2, 64, 16

    p = jax.random.uniform(k[0], (B, T, 3), jnp.float32, minval=-0.5, maxval=0.5)
    # include a few all-zero points to exercise zero_point_indices masking
    p = p.at[0, 0].set(0.0)
    p = p.at[1, 3].set(0.0)
    r = jax.random.normal(k[1], (B, T, 4), jnp.float32)
    c_planes = {
        'xz': jax.random.normal(k[2], (B, C_DIM, RES, RES), jnp.float32),
        'xy': jax.random.normal(k[3], (B, C_DIM, RES, RES), jnp.float32),
        'yz': jax.random.normal(k[4], (B, C_DIM, RES, RES), jnp.float32),
    }
    params = init_params(k[5])

    fwd = jax.jit(local_decoder_forward)
    out = jax.block_until_ready(fwd(p, r, c_planes, params))
    assert out.shape == (B, T) and out.dtype == jnp.float32

    # Tight check: same bf16-operand / f32-accumulation math as the kernel.
    ref_bf16 = jax.block_until_ready(
        reference_forward(p, r, c_planes, params, mlp=reference_mlp_bf16))
    if not jnp.allclose(out, ref_bf16, atol=1e-2, rtol=1e-2):
        raise AssertionError("Pallas kernel mismatch vs bf16-math reference")

    # Loose sanity check against the pure-f32 PyTorch-equivalent reference.
    ref_f32 = jax.block_until_ready(reference_forward(p, r, c_planes, params))
    if not jnp.allclose(out, ref_f32, atol=1e-1, rtol=1e-1):
        raise AssertionError("Pallas kernel mismatch vs f32 reference")

    print("KERNEL_OK")
</pallas_src>

<mosaic_0001>
module attributes {stable_mosaic.version = 11 : i64} {
  func.func @_decoder_mlp_kernel(%arg0: i32, %arg1: memref<16x156xbf16, #tpu.memory_space<vmem>>, %arg2: memref<156x768xbf16, #tpu.memory_space<vmem>>, %arg3: memref<1x768xf32, #tpu.memory_space<vmem>>, %arg4: memref<5x128x128xbf16, #tpu.memory_space<vmem>>, %arg5: memref<5x1x128xf32, #tpu.memory_space<vmem>>, %arg6: memref<5x128x128xbf16, #tpu.memory_space<vmem>>, %arg7: memref<5x1x128xf32, #tpu.memory_space<vmem>>, %arg8: memref<128x4xbf16, #tpu.memory_space<vmem>>, %arg9: memref<1x4xf32, #tpu.memory_space<vmem>>, %arg10: memref<16x4xf32, #tpu.memory_space<vmem>>) attributes {dimension_semantics = [#tpu.dimension_semantics<parallel>], iteration_bounds = array<i64: 2>, scalar_prefetch = 0 : i64, scratch_operands = 0 : i64, tpu.core_type = #tpu.core_type<tc>, window_params = [{transform_indices = @transform_0, window_bounds = array<i64: 16, 156>}, {pipeline_mode = #tpu.pipeline_mode<synchronous>, transform_indices = @transform_1, window_bounds = array<i64: 156, 768>}, {pipeline_mode = #tpu.pipeline_mode<synchronous>, transform_indices = @transform_2, window_bounds = array<i64: 1, 768>}, {pipeline_mode = #tpu.pipeline_mode<synchronous>, transform_indices = @transform_3, window_bounds = array<i64: 5, 128, 128>}, {pipeline_mode = #tpu.pipeline_mode<synchronous>, transform_indices = @transform_4, window_bounds = array<i64: 5, 1, 128>}, {pipeline_mode = #tpu.pipeline_mode<synchronous>, transform_indices = @transform_5, window_bounds = array<i64: 5, 128, 128>}, {pipeline_mode = #tpu.pipeline_mode<synchronous>, transform_indices = @transform_6, window_bounds = array<i64: 5, 1, 128>}, {pipeline_mode = #tpu.pipeline_mode<synchronous>, transform_indices = @transform_7, window_bounds = array<i64: 128, 4>}, {pipeline_mode = #tpu.pipeline_mode<synchronous>, transform_indices = @transform_8, window_bounds = array<i64: 1, 4>}, {transform_indices = @transform_9, window_bounds = array<i64: 16, 4>}]} {
    %c0 = arith.constant 0 : index
    %c0_0 = arith.constant 0 : index
    %0 = vector.load %arg1[%c0, %c0_0] : memref<16x156xbf16, #tpu.memory_space<vmem>>, vector<16x156xbf16>
    %c0_1 = arith.constant 0 : index
    %c0_2 = arith.constant 0 : index
    %1 = vector.load %arg2[%c0_1, %c0_2] : memref<156x768xbf16, #tpu.memory_space<vmem>>, vector<156x768xbf16>
    %cst = arith.constant dense<0.000000e+00> : vector<16x768xf32>
    %2 = tpu.matmul %0, %1, %cst {dimension_numbers = #tpu.dot_dimension_numbers<[1], [0], [0], [1], [0, 0, 1, 1], [], []>} : vector<16x156xbf16>, vector<156x768xbf16>, vector<16x768xf32> -> vector<16x768xf32>
    %c0_3 = arith.constant 0 : index
    %c0_4 = arith.constant 0 : index
    %3 = vector.load %arg3[%c0_3, %c0_4] : memref<1x768xf32, #tpu.memory_space<vmem>>, vector<1x768xf32>
    %4 = vector.broadcast %3 : vector<1x768xf32> to vector<16x768xf32>
    %5 = arith.addf %2, %4 : vector<16x768xf32>
    %6 = vector.extract_strided_slice %5 {offsets = [0, 0], sizes = [16, 128], strides = [1, 1]} : vector<16x768xf32> to vector<16x128xf32>
    %7 = vector.extract_strided_slice %5 {offsets = [0, 128], sizes = [16, 128], strides = [1, 1]} : vector<16x768xf32> to vector<16x128xf32>
    %8 = arith.addf %6, %7 : vector<16x128xf32>
    %cst_5 = arith.constant 0.000000e+00 : f32
    %9 = vector.broadcast %cst_5 : f32 to vector<16x128xf32>
    %10 = arith.maximumf %8, %9 : vector<16x128xf32>
    %11 = arith.truncf %10 : vector<16x128xf32> to vector<16x128xbf16>
    %c0_6 = arith.constant 0 : index
    %c0_7 = arith.constant 0 : index
    %c0_8 = arith.constant 0 : index
    %12 = vector.load %arg4[%c0_6, %c0_7, %c0_8] : memref<5x128x128xbf16, #tpu.memory_space<vmem>>, vector<1x128x128xbf16>
    %13 = vector.shape_cast %12 : vector<1x128x128xbf16> to vector<128x128xbf16>
    %cst_9 = arith.constant dense<0.000000e+00> : vector<16x128xf32>
    %14 = tpu.matmul %11, %13, %cst_9 {dimension_numbers = #tpu.dot_dimension_numbers<[1], [0], [0], [1], [0, 0, 1, 1], [], []>} : vector<16x128xbf16>, vector<128x128xbf16>, vector<16x128xf32> -> vector<16x128xf32>
    %c0_10 = arith.constant 0 : index
    %c0_11 = arith.constant 0 : index
    %c0_12 = arith.constant 0 : index
    %15 = vector.load %arg5[%c0_10, %c0_11, %c0_12] : memref<5x1x128xf32, #tpu.memory_space<vmem>>, vector<1x1x128xf32>
    %16 = vector.shape_cast %15 : vector<1x1x128xf32> to vector<1x128xf32>
    %17 = vector.broadcast %16 : vector<1x128xf32> to vector<16x128xf32>
    %18 = arith.addf %14, %17 : vector<16x128xf32>
    %cst_13 = arith.constant 0.000000e+00 : f32
    %19 = vector.broadcast %cst_13 : f32 to vector<16x128xf32>
    %20 = arith.maximumf %18, %19 : vector<16x128xf32>
    %21 = arith.truncf %20 : vector<16x128xf32> to vector<16x128xbf16>
    %c0_14 = arith.constant 0 : index
    %c0_15 = arith.constant 0 : index
    %c0_16 = arith.constant 0 : index
    %22 = vector.load %arg6[%c0_14, %c0_15, %c0_16] : memref<5x128x128xbf16, #tpu.memory_space<vmem>>, vector<1x128x128xbf16>
    %23 = vector.shape_cast %22 : vector<1x128x128xbf16> to vector<128x128xbf16>
    %cst_17 = arith.constant dense<0.000000e+00> : vector<16x128xf32>
    %24 = tpu.matmul %21, %23, %cst_17 {dimension_numbers = #tpu.dot_dimension_numbers<[1], [0], [0], [1], [0, 0, 1, 1], [], []>} : vector<16x128xbf16>, vector<128x128xbf16>, vector<16x128xf32> -> vector<16x128xf32>
    %c0_18 = arith.constant 0 : index
    %c0_19 = arith.constant 0 : index
    %c0_20 = arith.constant 0 : index
    %25 = vector.load %arg7[%c0_18, %c0_19, %c0_20] : memref<5x1x128xf32, #tpu.memory_space<vmem>>, vector<1x1x128xf32>
    %26 = vector.shape_cast %25 : vector<1x1x128xf32> to vector<1x128xf32>
    %27 = vector.broadcast %26 : vector<1x128xf32> to vector<16x128xf32>
    %28 = arith.addf %24, %27 : vector<16x128xf32>
    %29 = arith.addf %8, %28 : vector<16x128xf32>
    %30 = vector.extract_strided_slice %5 {offsets = [0, 256], sizes = [16, 128], strides = [1, 1]} : vector<16x768xf32> to vector<16x128xf32>
    %31 = arith.addf %29, %30 : vector<16x128xf32>
    %cst_21 = arith.constant 0.000000e+00 : f32
    %32 = vector.broadcast %cst_21 : f32 to vector<16x128xf32>
    %33 = arith.maximumf %31, %32 : vector<16x128xf32>
    %34 = arith.truncf %33 : vector<16x128xf32> to vector<16x128xbf16>
    %c1 = arith.constant 1 : index
    %c0_22 = arith.constant 0 : index
    %c0_23 = arith.constant 0 : index
    %35 = vector.load %arg4[%c1, %c0_22, %c0_23] : memref<5x128x128xbf16, #tpu.memory_space<vmem>>, vector<1x128x128xbf16>
    %36 = vector.shape_cast %35 : vector<1x128x128xbf16> to vector<128x128xbf16>
    %cst_24 = arith.constant dense<0.000000e+00> : vector<16x128xf32>
    %37 = tpu.matmul %34, %36, %cst_24 {dimension_numbers = #tpu.dot_dimension_numbers<[1], [0], [0], [1], [0, 0, 1, 1], [], []>} : vector<16x128xbf16>, vector<128x128xbf16>, vector<16x128xf32> -> vector<16x128xf32>
    %c1_25 = arith.constant 1 : index
    %c0_26 = arith.constant 0 : index
    %c0_27 = arith.constant 0 : index
    %38 = vector.load %arg5[%c1_25, %c0_26, %c0_27] : memref<5x1x128xf32, #tpu.memory_space<vmem>>, vector<1x1x128xf32>
    %39 = vector.shape_cast %38 : vector<1x1x128xf32> to vector<1x128xf32>
    %40 = vector.broadcast %39 : vector<1x128xf32> to vector<16x128xf32>
    %41 = arith.addf %37, %40 : vector<16x128xf32>
    %cst_28 = arith.constant 0.000000e+00 : f32
    %42 = vector.broadcast %cst_28 : f32 to vector<16x128xf32>
    %43 = arith.maximumf %41, %42 : vector<16x128xf32>
    %44 = arith.truncf %43 : vector<16x128xf32> to vector<16x128xbf16>
    %c1_29 = arith.constant 1 : index
    %c0_30 = arith.constant 0 : index
    %c0_31 = arith.constant 0 : index
    %45 = vector.load %arg6[%c1_29, %c0_30, %c0_31] : memref<5x128x128xbf16, #tpu.memory_space<vmem>>, vector<1x128x128xbf16>
    %46 = vector.shape_cast %45 : vector<1x128x128xbf16> to vector<128x128xbf16>
    %cst_32 = arith.constant dense<0.000000e+00> : vector<16x128xf32>
    %47 = tpu.matmul %44, %46, %cst_32 {dimension_numbers = #tpu.dot_dimension_numbers<[1], [0], [0], [1], [0, 0, 1, 1], [], []>} : vector<16x128xbf16>, vector<128x128xbf16>, vector<16x128xf32> -> vector<16x128xf32>
    %c1_33 = arith.constant 1 : index
    %c0_34 = arith.constant 0 : index
    %c0_35 = arith.constant 0 : index
    %48 = vector.load %arg7[%c1_33, %c0_34, %c0_35] : memref<5x1x128xf32, #tpu.memory_space<vmem>>, vector<1x1x128xf32>
    %49 = vector.shape_cast %48 : vector<1x1x128xf32> to vector<1x128xf32>
    %50 = vector.broadcast %49 : vector<1x128xf32> to vector<16x128xf32>
    %51 = arith.addf %47, %50 : vector<16x128xf32>
    %52 = arith.addf %31, %51 : vector<16x128xf32>
    %53 = vector.extract_strided_slice %5 {offsets = [0, 384], sizes = [16, 128], strides = [1, 1]} : vector<16x768xf32> to vector<16x128xf32>
    %54 = arith.addf %52, %53 : vector<16x128xf32>
    %cst_36 = arith.constant 0.000000e+00 : f32
    %55 = vector.broadcast %cst_36 : f32 to vector<16x128xf32>
    %56 = arith.maximumf %54, %55 : vector<16x128xf32>
    %57 = arith.truncf %56 : vector<16x128xf32> to vector<16x128xbf16>
    %c2 = arith.constant 2 : index
    %c0_37 = arith.constant 0 : index
    %c0_38 = arith.constant 0 : index
    %58 = vector.load %arg4[%c2, %c0_37, %c0_38] : memref<5x128x128xbf16, #tpu.memory_space<vmem>>, vector<1x128x128xbf16>
    %59 = vector.shape_cast %58 : vector<1x128x128xbf16> to vector<128x128xbf16>
    %cst_39 = arith.constant dense<0.000000e+00> : vector<16x128xf32>
    %60 = tpu.matmul %57, %59, %cst_39 {dimension_numbers = #tpu.dot_dimension_numbers<[1], [0], [0], [1], [0, 0, 1, 1], [], []>} : vector<16x128xbf16>, vector<128x128xbf16>, vector<16x128xf32> -> vector<16x128xf32>
    %c2_40 = arith.constant 2 : index
    %c0_41 = arith.constant 0 : index
    %c0_42 = arith.constant 0 : index
    %61 = vector.load %arg5[%c2_40, %c0_41, %c0_42] : memref<5x1x128xf32, #tpu.memory_space<vmem>>, vector<1x1x128xf32>
    %62 = vector.shape_cast %61 : vector<1x1x128xf32> to vector<1x128xf32>
    %63 = vector.broadcast %62 : vector<1x128xf32> to vector<16x128xf32>
    %64 = arith.addf %60, %63 : vector<16x128xf32>
    %cst_43 = arith.constant 0.000000e+00 : f32
    %65 = vector.broadcast %cst_43 : f32 to vector<16x128xf32>
    %66 = arith.maximumf %64, %65 : vector<16x128xf32>
    %67 = arith.truncf %66 : vector<16x128xf32> to vector<16x128xbf16>
    %c2_44 = arith.constant 2 : index
    %c0_45 = arith.constant 0 : index
    %c0_46 = arith.constant 0 : index
    %68 = vector.load %arg6[%c2_44, %c0_45, %c0_46] : memref<5x128x128xbf16, #tpu.memory_space<vmem>>, vector<1x128x128xbf16>
    %69 = vector.shape_cast %68 : vector<1x128x128xbf16> to vector<128x128xbf16>
    %cst_47 = arith.constant dense<0.000000e+00> : vector<16x128xf32>
    %70 = tpu.matmul %67, %69, %cst_47 {dimension_numbers = #tpu.dot_dimension_numbers<[1], [0], [0], [1], [0, 0, 1, 1], [], []>} : vector<16x128xbf16>, vector<128x128xbf16>, vector<16x128xf32> -> vector<16x128xf32>
    %c2_48 = arith.constant 2 : index
    %c0_49 = arith.constant 0 : index
    %c0_50 = arith.constant 0 : index
    %71 = vector.load %arg7[%c2_48, %c0_49, %c0_50] : memref<5x1x128xf32, #tpu.memory_space<vmem>>, vector<1x1x128xf32>
    %72 = vector.shape_cast %71 : vector<1x1x128xf32> to vector<1x128xf32>
    %73 = vector.broadcast %72 : vector<1x128xf32> to vector<16x128xf32>
    %74 = arith.addf %70, %73 : vector<16x128xf32>
    %75 = arith.addf %54, %74 : vector<16x128xf32>
    %76 = vector.extract_strided_slice %5 {offsets = [0, 512], sizes = [16, 128], strides = [1, 1]} : vector<16x768xf32> to vector<16x128xf32>
    %77 = arith.addf %75, %76 : vector<16x128xf32>
    %cst_51 = arith.constant 0.000000e+00 : f32
    %78 = vector.broadcast %cst_51 : f32 to vector<16x128xf32>
    %79 = arith.maximumf %77, %78 : vector<16x128xf32>
    %80 = arith.truncf %79 : vector<16x128xf32> to vector<16x128xbf16>
    %c3 = arith.constant 3 : index
    %c0_52 = arith.constant 0 : index
    %c0_53 = arith.constant 0 : index
    %81 = vector.load %arg4[%c3, %c0_52, %c0_53] : memref<5x128x128xbf16, #tpu.memory_space<vmem>>, vector<1x128x128xbf16>
    %82 = vector.shape_cast %81 : vector<1x128x128xbf16> to vector<128x128xbf16>
    %cst_54 = arith.constant dense<0.000000e+00> : vector<16x128xf32>
    %83 = tpu.matmul %80, %82, %cst_54 {dimension_numbers = #tpu.dot_dimension_numbers<[1], [0], [0], [1], [0, 0, 1, 1], [], []>} : vector<16x128xbf16>, vector<128x128xbf16>, vector<16x128xf32> -> vector<16x128xf32>
    %c3_55 = arith.constant 3 : index
    %c0_56 = arith.constant 0 : index
    %c0_57 = arith.constant 0 : index
    %84 = vector.load %arg5[%c3_55, %c0_56, %c0_57] : memref<5x1x128xf32, #tpu.memory_space<vmem>>, vector<1x1x128xf32>
    %85 = vector.shape_cast %84 : vector<1x1x128xf32> to vector<1x128xf32>
    %86 = vector.broadcast %85 : vector<1x128xf32> to vector<16x128xf32>
    %87 = arith.addf %83, %86 : vector<16x128xf32>
    %cst_58 = arith.constant 0.000000e+00 : f32
    %88 = vector.broadcast %cst_58 : f32 to vector<16x128xf32>
    %89 = arith.maximumf %87, %88 : vector<16x128xf32>
    %90 = arith.truncf %89 : vector<16x128xf32> to vector<16x128xbf16>
    %c3_59 = arith.constant 3 : index
    %c0_60 = arith.constant 0 : index
    %c0_61 = arith.constant 0 : index
    %91 = vector.load %arg6[%c3_59, %c0_60, %c0_61] : memref<5x128x128xbf16, #tpu.memory_space<vmem>>, vector<1x128x128xbf16>
    %92 = vector.shape_cast %91 : vector<1x128x128xbf16> to vector<128x128xbf16>
    %cst_62 = arith.constant dense<0.000000e+00> : vector<16x128xf32>
    %93 = tpu.matmul %90, %92, %cst_62 {dimension_numbers = #tpu.dot_dimension_numbers<[1], [0], [0], [1], [0, 0, 1, 1], [], []>} : vector<16x128xbf16>, vector<128x128xbf16>, vector<16x128xf32> -> vector<16x128xf32>
    %c3_63 = arith.constant 3 : index
    %c0_64 = arith.constant 0 : index
    %c0_65 = arith.constant 0 : index
    %94 = vector.load %arg7[%c3_63, %c0_64, %c0_65] : memref<5x1x128xf32, #tpu.memory_space<vmem>>, vector<1x1x128xf32>
    %95 = vector.shape_cast %94 : vector<1x1x128xf32> to vector<1x128xf32>
    %96 = vector.broadcast %95 : vector<1x128xf32> to vector<16x128xf32>
    %97 = arith.addf %93, %96 : vector<16x128xf32>
    %98 = arith.addf %77, %97 : vector<16x128xf32>
    %99 = vector.extract_strided_slice %5 {offsets = [0, 640], sizes = [16, 128], strides = [1, 1]} : vector<16x768xf32> to vector<16x128xf32>
    %100 = arith.addf %98, %99 : vector<16x128xf32>
    %cst_66 = arith.constant 0.000000e+00 : f32
    %101 = vector.broadcast %cst_66 : f32 to vector<16x128xf32>
    %102 = arith.maximumf %100, %101 : vector<16x128xf32>
    %103 = arith.truncf %102 : vector<16x128xf32> to vector<16x128xbf16>
    %c4 = arith.constant 4 : index
    %c0_67 = arith.constant 0 : index
    %c0_68 = arith.constant 0 : index
    %104 = vector.load %arg4[%c4, %c0_67, %c0_68] : memref<5x128x128xbf16, #tpu.memory_space<vmem>>, vector<1x128x128xbf16>
    %105 = vector.shape_cast %104 : vector<1x128x128xbf16> to vector<128x128xbf16>
    %cst_69 = arith.constant dense<0.000000e+00> : vector<16x128xf32>
    %106 = tpu.matmul %103, %105, %cst_69 {dimension_numbers = #tpu.dot_dimension_numbers<[1], [0], [0], [1], [0, 0, 1, 1], [], []>} : vector<16x128xbf16>, vector<128x128xbf16>, vector<16x128xf32> -> vector<16x128xf32>
    %c4_70 = arith.constant 4 : index
    %c0_71 = arith.constant 0 : index
    %c0_72 = arith.constant 0 : index
    %107 = vector.load %arg5[%c4_70, %c0_71, %c0_72] : memref<5x1x128xf32, #tpu.memory_space<vmem>>, vector<1x1x128xf32>
    %108 = vector.shape_cast %107 : vector<1x1x128xf32> to vector<1x128xf32>
    %109 = vector.broadcast %108 : vector<1x128xf32> to vector<16x128xf32>
    %110 = arith.addf %106, %109 : vector<16x128xf32>
    %cst_73 = arith.constant 0.000000e+00 : f32
    %111 = vector.broadcast %cst_73 : f32 to vector<16x128xf32>
    %112 = arith.maximumf %110, %111 : vector<16x128xf32>
    %113 = arith.truncf %112 : vector<16x128xf32> to vector<16x128xbf16>
    %c4_74 = arith.constant 4 : index
    %c0_75 = arith.constant 0 : index
    %c0_76 = arith.constant 0 : index
    %114 = vector.load %arg6[%c4_74, %c0_75, %c0_76] : memref<5x128x128xbf16, #tpu.memory_space<vmem>>, vector<1x128x128xbf16>
    %115 = vector.shape_cast %114 : vector<1x128x128xbf16> to vector<128x128xbf16>
    %cst_77 = arith.constant dense<0.000000e+00> : vector<16x128xf32>
    %116 = tpu.matmul %113, %115, %cst_77 {dimension_numbers = #tpu.dot_dimension_numbers<[1], [0], [0], [1], [0, 0, 1, 1], [], []>} : vector<16x128xbf16>, vector<128x128xbf16>, vector<16x128xf32> -> vector<16x128xf32>
    %c4_78 = arith.constant 4 : index
    %c0_79 = arith.constant 0 : index
    %c0_80 = arith.constant 0 : index
    %117 = vector.load %arg7[%c4_78, %c0_79, %c0_80] : memref<5x1x128xf32, #tpu.memory_space<vmem>>, vector<1x1x128xf32>
    %118 = vector.shape_cast %117 : vector<1x1x128xf32> to vector<1x128xf32>
    %119 = vector.broadcast %118 : vector<1x128xf32> to vector<16x128xf32>
    %120 = arith.addf %116, %119 : vector<16x128xf32>
    %121 = arith.addf %100, %120 : vector<16x128xf32>
    %cst_81 = arith.constant 0.000000e+00 : f32
    %122 = vector.broadcast %cst_81 : f32 to vector<16x128xf32>
    %123 = arith.maximumf %121, %122 : vector<16x128xf32>
    %124 = arith.truncf %123 : vector<16x128xf32> to vector<16x128xbf16>
    %c0_82 = arith.constant 0 : index
    %c0_83 = arith.constant 0 : index
    %125 = vector.load %arg8[%c0_82, %c0_83] : memref<128x4xbf16, #tpu.memory_space<vmem>>, vector<128x4xbf16>
    %cst_84 = arith.constant dense<0.000000e+00> : vector<16x4xf32>
    %126 = tpu.matmul %124, %125, %cst_84 {dimension_numbers = #tpu.dot_dimension_numbers<[1], [0], [0], [1], [0, 0, 1, 1], [], []>} : vector<16x128xbf16>, vector<128x4xbf16>, vector<16x4xf32> -> vector<16x4xf32>
    %c0_85 = arith.constant 0 : index
    %c0_86 = arith.constant 0 : index
    %127 = vector.load %arg9[%c0_85, %c0_86] : memref<1x4xf32, #tpu.memory_space<vmem>>, vector<1x4xf32>
    %128 = vector.broadcast %127 : vector<1x4xf32> to vector<16x4xf32>
    %129 = arith.addf %126, %128 : vector<16x4xf32>
    %c0_87 = arith.constant 0 : index
    %c0_88 = arith.constant 0 : index
    %130 = vector.load %arg10[%c0_87, %c0_88] : memref<16x4xf32, #tpu.memory_space<vmem>>, vector<16x4xf32>
    tpu.vector_store %arg10[%c0_87, %c0_88], %129 {strides = array<i32>} : memref<16x4xf32, #tpu.memory_space<vmem>>, vector<16x4xf32>,
    return
  }
  func.func @transform_0(%arg0: i32) -> (i32, i32) {
    %c0_i32 = arith.constant 0 : i32
    %c0_i32_0 = arith.constant 0 : i32
    return %arg0, %c0_i32 : i32, i32
  }
  func.func @transform_1(%arg0: i32) -> (i32, i32) {
    %c0_i32 = arith.constant 0 : i32
    %c0_i32_0 = arith.constant 0 : i32
    %c0_i32_1 = arith.constant 0 : i32
    return %c0_i32, %c0_i32_0 : i32, i32
  }
  func.func @transform_2(%arg0: i32) -> (i32, i32) {
    %c0_i32 = arith.constant 0 : i32
    %c0_i32_0 = arith.constant 0 : i32
    %c0_i32_1 = arith.constant 0 : i32
    return %c0_i32, %c0_i32_0 : i32, i32
  }
  func.func @transform_3(%arg0: i32) -> (i32, i32, i32) {
    %c0_i32 = arith.constant 0 : i32
    %c0_i32_0 = arith.constant 0 : i32
    %c0_i32_1 = arith.constant 0 : i32
    %c0_i32_2 = arith.constant 0 : i32
    return %c0_i32, %c0_i32_0, %c0_i32_1 : i32, i32, i32
  }
  func.func @transform_4(%arg0: i32) -> (i32, i32, i32) {
    %c0_i32 = arith.constant 0 : i32
    %c0_i32_0 = arith.constant 0 : i32
    %c0_i32_1 = arith.constant 0 : i32
    %c0_i32_2 = arith.constant 0 : i32
    return %c0_i32, %c0_i32_0, %c0_i32_1 : i32, i32, i32
  }
  func.func @transform_5(%arg0: i32) -> (i32, i32, i32) {
    %c0_i32 = arith.constant 0 : i32
    %c0_i32_0 = arith.constant 0 : i32
    %c0_i32_1 = arith.constant 0 : i32
    %c0_i32_2 = arith.constant 0 : i32
    return %c0_i32, %c0_i32_0, %c0_i32_1 : i32, i32, i32
  }
  func.func @transform_6(%arg0: i32) -> (i32, i32, i32) {
    %c0_i32 = arith.constant 0 : i32
    %c0_i32_0 = arith.constant 0 : i32
    %c0_i32_1 = arith.constant 0 : i32
    %c0_i32_2 = arith.constant 0 : i32
    return %c0_i32, %c0_i32_0, %c0_i32_1 : i32, i32, i32
  }
  func.func @transform_7(%arg0: i32) -> (i32, i32) {
    %c0_i32 = arith.constant 0 : i32
    %c0_i32_0 = arith.constant 0 : i32
    %c0_i32_1 = arith.constant 0 : i32
    return %c0_i32, %c0_i32_0 : i32, i32
  }
  func.func @transform_8(%arg0: i32) -> (i32, i32) {
    %c0_i32 = arith.constant 0 : i32
    %c0_i32_0 = arith.constant 0 : i32
    %c0_i32_1 = arith.constant 0 : i32
    return %c0_i32, %c0_i32_0 : i32, i32
  }
  func.func @transform_9(%arg0: i32) -> (i32, i32) {
    %c0_i32 = arith.constant 0 : i32
    %c0_i32_0 = arith.constant 0 : i32
    return %arg0, %c0_i32 : i32, i32
  }
}

</mosaic_0001>

<bundles_post_ra>
// kernel: local_decoder_forward.1
= control target key start
LH: loop header
LB: loop body
LE: loop exit
PB: predicated region body
PF: predicated region fallthrough
CT: control target
= control target key end

     0   :  { %s3135_s30 = smov 0   ;;  %s3839_s0 = inlined_call_operand.vmem [shape: bf16[32,156], index: 0, kind: input, shape index: {}]   ;;  %s3840_s1 = inlined_call_operand.vmem [shape: bf16[156,768], index: 1, kind: input, shape index: {}]   ;;  %s3841_s2 = inlined_call_operand.vmem [shape: f32[1,768], index: 2, kind: input, shape index: {}]   ;;  %s3842_s3 = inlined_call_operand.vmem [shape: bf16[5,128,128], index: 3, kind: input, shape index: {}]   ;;  %s3843_s4 = inlined_call_operand.vmem [shape: f32[5,1,128], index: 4, kind: input, shape index: {}]   ;;  %s3844_s5 = inlined_call_operand.vmem [shape: bf16[5,128,128], index: 5, kind: input, shape index: {}]   ;;  %s3845_s6 = inlined_call_operand.vmem [shape: f32[5,1,128], index: 6, kind: input, shape index: {}]   ;;  %s3846_s7 = inlined_call_operand.vmem [shape: bf16[128,4], index: 7, kind: input, shape index: {}]   ;;  %s3847_s8 = inlined_call_operand.vmem [shape: f32[1,4], index: 8, kind: input, shape index: {}]   ;;  %s3848_s9 = inlined_call_operand.vmem [shape: f32[32,4], index: 9, kind: output, shape index: {}]  }
   0x1 LB: > { %s2249_s10 = sadd.s32 4294967295, %s3081_s30   ;;  %p2253_p0 = scmp.ge.s32.totalorder %s3081_s30, 1  ;;  %s3081_s30 = sphi %s3135_s30, %s19_s30  }
   0x2   : > { %p289_p1 = scmp.lt.s32.totalorder %s3081_s30, 3 }
   0x4   : > { %p290_p2 = pnand %p2253_p0, %p289_p1 }
   0x5   : > { %v2894_v0 = vld [vmem:[%s3840_s1 + $0x4] ss:$24 sps:$4 sm:$0xff] (!%p290_p2)   ;;  %s2254_s13 = sshll.u32 (!%p290_p2), %s2249_s10, 1  ;;  %v2896_v1 = vld [vmem:[%s3840_s1] ss:$24 sps:$4 sm:$0xff] (!%p290_p2)   ;;  %vm737_vm0 = vcmask (!%p290_p2), 228352   ;;  %v404_v53 = vlaneseq (!%p290_p2) }
   0x6   : > { %293 = sbr.rel (%p290_p2) target bundleno = 2704 (0xa90), region = 56  ;;  %p327_p3 = scmp.lt.s32.totalorder (!%p290_p2), %s2254_s13, 3  ;;  %760 = vmatprep.subr.bf16.mxu0 (!%p290_p2), %v2894_v0  ;;  %v2897_v2 = vld [vmem:[%s3840_s1 + $0x34] ss:$24 sps:$4 sm:$0xff] (!%p290_p2)   ;;  %v2899_v3 = vld [vmem:[%s3840_s1 + $0x30] ss:$24 sps:$4 sm:$0xff] (!%p290_p2)  }
   0x7   : > { %761 = vmatpush1.bf16.msra.mxu0 (!%p290_p2), %v2896_v1  ;;  %v2900_v4 = vld [vmem:[%s3840_s1 + $0x64] ss:$24 sps:$4 sm:$0xff] (!%p290_p2)   ;;  %v2902_v5 = vld [vmem:[%s3840_s1 + $0x60] ss:$24 sps:$4 sm:$0xff] (!%p290_p2)   ;;  %v2903_v6 = vld [vmem:[%s3840_s1 + $0x94] ss:$24 sps:$4 sm:$0xff] (!%p290_p2)  }
   0x8   : > { %762 = vmatprep.subr.bf16.mxu0 (!%p290_p2), %v2897_v2  ;;  %v2905_v7 = vld [vmem:[%s3840_s1 + $0x90] ss:$24 sps:$4 sm:$0xff] (!%p290_p2)   ;;  %v2906_v8 = vld [vmem:[%s3840_s1 + $0xc4] ss:$24 sps:$4 sm:$0xff] (!%p290_p2)   ;;  %v2908_v9 = vld [vmem:[%s3840_s1 + $0xc0] ss:$24 sps:$4 sm:$0xff] (!%p290_p2)  }
   0x9   : > { %v2909_v10 = vld [vmem:[%s3840_s1 + $0xf4] ss:$24 sps:$4 sm:$0xff] (!%p290_p2)   ;;  %v2929_v13 = vld [vmem:[%s3840_s1 + $0x8] ss:$24 sps:$4 sm:$0xff] (!%p290_p2)   ;;  %v2932_v15 = vld [vmem:[%s3840_s1 + $0x38] ss:$24 sps:$4 sm:$0xff] (!%p290_p2)  }
   0xa   : > { %v2927_v12 = vld [vmem:[%s3840_s1 + $0xc] ss:$24 sps:$4 sm:$0xff] (!%p290_p2)   ;;  %v2930_v14 = vld [vmem:[%s3840_s1 + $0x3c] ss:$24 sps:$4 sm:$0xff] (!%p290_p2)   ;;  %v2911_v16 = vld [vmem:[%s3840_s1 + $0xf0] ss:$24 sps:$4 sm:$0xff] (!%p290_p2)  }
   0xb   : > { %763 = vmatpush1.bf16.msra.mxu0 (!%p290_p2), %v2899_v3  ;;  %803 = vmatprep.subr.bf16.mxu1 (!%p290_p2), %v2927_v12  ;;  %v2933_v17 = vld [vmem:[%s3840_s1 + $0x6c] ss:$24 sps:$4 sm:$0xff] (!%p290_p2)   ;;  %v2914_v19 = vld [vmem:[%s3840_s1 + $0x120] ss:$24 sps:$4 sm:$0xff] (!%p290_p2)   ;;  %v2936_v22 = vld [vmem:[%s3840_s1 + $0x9c] ss:$24 sps:$4 sm:$0xff] (!%p290_p2)  }
   0xc   : > { %764 = vmatprep.subr.bf16.mxu0 (!%p290_p2), %v2900_v4  ;;  %804 = vmatpush1.bf16.msra.mxu1 (!%p290_p2), %v2929_v13  ;;  %v2912_v18 = vld [vmem:[%s3840_s1 + $0x124] ss:$24 sps:$4 sm:$0xff] (!%p290_p2)   ;;  %v2935_v20 = vld [vmem:[%s3840_s1 + $0x68] ss:$24 sps:$4 sm:$0xff] (!%p290_p2)   ;;  %v2915_v21 = vld [vmem:[%s3840_s1 + $0x154] ss:$24 sps:$4 sm:$0xff] (!%p290_p2)  }
   0xd   : > { %s3850_s13 = smov (!%p327_p3, %s2254_s13), 3  ;;  %805 = vmatprep.subr.bf16.mxu1 %v2930_v14  ;;  %v2923_v23 = vld [vmem:[%s3840_s1 + $0x1b0] ss:$24 sps:$4 sm:$0x3f]   ;;  %vm741_vm1 = vcmask 1045504   ;;  %v2957_v44 = vld [vmem:[%s3842_s3] sm:$0xff]  }
   0xe   : > { %s2564_s26 = sshll.u32 %s3850_s13, 3  ;;  %v2938_v24 = vld [vmem:[%s3840_s1 + $0x98] ss:$24 sps:$4 sm:$0xff]   ;;  %v2939_v26 = vld [vmem:[%s3840_s1 + $0xcc] ss:$24 sps:$4 sm:$0xff]   ;;  %v743_v28 = vsel %vm741_vm1, %v2923_v23, 0 }
   0xf   : > { %765 = vmatpush1.bf16.msra.mxu0 %v2902_v5  ;;  %s3175_s11 = scalar_lea.vmem %s3839_s0, %s2564_s26  ;;  %v2917_v25 = vld [vmem:[%s3840_s1 + $0x150] ss:$24 sps:$4 sm:$0xff]   ;;  %v2918_v27 = vld [vmem:[%s3840_s1 + $0x184] ss:$24 sps:$4 sm:$0xff]   ;;  %v2920_v29 = vld [vmem:[%s3840_s1 + $0x180] ss:$24 sps:$4 sm:$0xff]   ;;  %s337_s16 = scalar_lea.vmem %s3848_s9, %s2564_s26 }
  0x10   : > { %766 = vmatprep.subr.bf16.mxu0 %v2903_v6  ;;  %v2924_v11 = vld [vmem:[%s3175_s11 + $0x4] ss:$8 sps:$4 sm:$0xff]   ;;  %806 = vmatpush1.bf16.msra.mxu1 %v2932_v15  ;;  %v2941_v31 = vld [vmem:[%s3840_s1 + $0xc8] ss:$24 sps:$4 sm:$0xff]   ;;  %v2942_v32 = vld [vmem:[%s3840_s1 + $0xfc] ss:$24 sps:$4 sm:$0xff]  }
  0x11   : > { %2322 = vmatprep.mubr.msk.bf16.mxu0 %vm737_vm0, %v2924_v11  ;;  %2324 = vmatprep.mubr.msk.bf16.mxu1 %vm737_vm0, %v2924_v11  ;;  %v2921_v30 = vld [vmem:[%s3840_s1 + $0x1b4] ss:$24 sps:$4 sm:$0x3f]   ;;  %v2944_v33 = vld [vmem:[%s3840_s1 + $0xf8] ss:$24 sps:$4 sm:$0xff]   ;;  %v3083_v45 = vmov 0.0  }
  0x12   : > { %807 = vmatprep.subr.bf16.mxu1 %v2933_v17  ;;  %v2945_v34 = vld [vmem:[%s3840_s1 + $0x12c] ss:$24 sps:$4 sm:$0xff]   ;;  %v3258_v35 = vld [vmem:[%s3175_s11] ss:$8 sps:$4 sm:$0xff]   ;;  %v2948_v37 = vld [vmem:[%s3840_s1 + $0x15c] ss:$24 sps:$4 sm:$0xff]  }
  0x13   : > { %767 = vmatpush1.bf16.msra.mxu0 %v2905_v7  ;;  %v2947_v36 = vld [vmem:[%s3840_s1 + $0x128] ss:$24 sps:$4 sm:$0xff]   ;;  %v2950_v38 = vld [vmem:[%s3840_s1 + $0x158] ss:$24 sps:$4 sm:$0xff]   ;;  %v2951_v40 = vld [vmem:[%s3840_s1 + $0x18c] ss:$24 sps:$4 sm:$0xff]  }
  0x14   : > { %768 = vmatprep.subr.bf16.mxu0 %v2906_v8  ;;  %808 = vmatpush1.bf16.msra.mxu1 %v2935_v20  ;;  %v2956_v39 = vld [vmem:[%s3840_s1 + $0x1b8] ss:$24 sps:$4 sm:$0x3f]   ;;  %v2953_v41 = vld [vmem:[%s3840_s1 + $0x188] ss:$24 sps:$4 sm:$0xff]   ;;  %vm3084_vm2 = vmmov 0  }
  0x15   : > { %809 = vmatprep.subr.bf16.mxu1 %v2936_v22  ;;  %v2954_v42 = vld [vmem:[%s3840_s1 + $0x1bc] ss:$24 sps:$4 sm:$0x3f]   ;;  %v749_v43 = vsel %vm741_vm1, %v2956_v39, 0  ;;  %v2958_v46 = vld [vmem:[%s3842_s3 + $0x8] sm:$0xff]   ;;  %v2961_v49 = vld [vmem:[%s3842_s3 + $0x20] sm:$0xff]  }
  0x16   : > { %v2959_v47 = vld [vmem:[%s3842_s3 + $0x10] sm:$0xff]   ;;  %v2960_v48 = vld [vmem:[%s3842_s3 + $0x18] sm:$0xff]   ;;  %v2962_v50 = vld [vmem:[%s3842_s3 + $0x28] sm:$0xff]   ;;  %v3321_v54 = vshrl.u32 %v404_v53, 7  ;;  %vm2190_vm3 = vcmask 31744  }
  0x17   : > { %769 = vmatpush1.bf16.msra.mxu0 %v2908_v9  ;;  %v2963_v51 = vld [vmem:[%s3842_s3 + $0x30] sm:$0xff]   ;;  %v2964_v52 = vld [vmem:[%s3842_s3 + $0x38] sm:$0xff]   ;;  %v3327_v56 = vld [vmem:[%s3841_s2] sm:$0x3f] }
  0x18   : > { %770 = vmatprep.subr.bf16.mxu0 %v2909_v10  ;;  %810 = vmatpush1.bf16.msra.mxu1 %v2938_v24  ;;  %v406_v55 = vsub.s32 0, %v3321_v54  ;;  %v410_v57 = vsub.s32 1, %v3321_v54  ;;  %v2965_v8 = vld [vmem:[%s3844_s5] sm:$0xff]   ;;  %v2966_v10 = vld [vmem:[%s3844_s5 + $0x8] sm:$0xff]   ;;  %v2967_v14 = vld [vmem:[%s3844_s5 + $0x10] sm:$0xff]  }
  0x19   : > { %811 = vmatprep.subr.bf16.mxu1 %v2939_v26  ;;  %v2969_v17 = vld [vmem:[%s3844_s5 + $0x20] sm:$0xff]   ;;  %v2972_v20 = vld [vmem:[%s3844_s5 + $0x38] sm:$0xff]   ;;  %v2975_v22 = vld [vmem:[%s3840_s1 + $0x14] ss:$24 sps:$4 sm:$0xff]  }
  0x1a   : > { %v407_v58 = vrot.slane %v3327_v56, %v406_v55  ;;  %v411_v59 = vrot.slane %v3327_v56, %v410_v57  ;;  %v2978_v23 = vld [vmem:[%s3840_s1 + $0x44] ss:$24 sps:$4 sm:$0xff]   ;;  %v2976_v24 = vld [vmem:[%s3840_s1 + $0x40] ss:$24 sps:$4 sm:$0xff]   ;;  %v2979_v26 = vld [vmem:[%s3840_s1 + $0x70] ss:$24 sps:$4 sm:$0xff]  }
  0x1b   : > { %771 = vmatpush1.bf16.msra.mxu0 %v2911_v16  ;;  %v2968_v16 = vld [vmem:[%s3844_s5 + $0x18] sm:$0xff]   ;;  %v2997_v39 = vld [vmem:[%s3840_s1 + $0x190] ss:$24 sps:$4 sm:$0xff]  }
  0x1c   : > { %772 = vmatprep.subr.bf16.mxu0 %v2912_v18  ;;  %812 = vmatpush1.bf16.msra.mxu1 %v2941_v31  ;;  %v2970_v18 = vld [vmem:[%s3844_s5 + $0x28] sm:$0xff]   ;;  %v2990_v31 = vld [vmem:[%s3840_s1 + $0x104] ss:$24 sps:$4 sm:$0xff]  }
  0x1d   : > { %813 = vmatprep.subr.bf16.mxu1 %v2942_v32  ;;  %v2988_v32 = vld [vmem:[%s3840_s1 + $0x100] ss:$24 sps:$4 sm:$0xff]  }
  0x1f   : > { %773 = vmatpush1.bf16.msra.mxu0 %v2914_v19  ;;  %v2971_v19 = vld [vmem:[%s3844_s5 + $0x30] sm:$0xff]  }
  0x20   : > { %774 = vmatprep.subr.bf16.mxu0 %v2915_v21  ;;  %814 = vmatpush1.bf16.msra.mxu1 %v2944_v33  ;;  %v2973_v21 = vld [vmem:[%s3840_s1 + $0x10] ss:$24 sps:$4 sm:$0xff]   ;;  %v2993_v33 = vld [vmem:[%s3840_s1 + $0x134] ss:$24 sps:$4 sm:$0xff]  }
  0x21   : > { %815 = vmatprep.subr.bf16.mxu1 %v2945_v34  ;;  %v2991_v34 = vld [vmem:[%s3840_s1 + $0x130] ss:$24 sps:$4 sm:$0xff]  }
  0x23   : > { %775 = vmatpush1.bf16.msra.mxu0 %v2917_v25  ;;  %v2981_v25 = vld [vmem:[%s3840_s1 + $0x74] ss:$24 sps:$4 sm:$0xff]  }
  0x24   : > { %776 = vmatprep.subr.bf16.mxu0 %v2918_v27  ;;  %816 = vmatpush1.bf16.msra.mxu1 %v2947_v36  ;;  %v2984_v27 = vld [vmem:[%s3840_s1 + $0xa4] ss:$24 sps:$4 sm:$0xff]  }
  0x25   : > { %817 = vmatprep.subr.bf16.mxu1 %v2948_v37  ;;  %v2996_v36 = vld [vmem:[%s3840_s1 + $0x164] ss:$24 sps:$4 sm:$0xff]   ;;  %v2994_v37 = vld [vmem:[%s3840_s1 + $0x160] ss:$24 sps:$4 sm:$0xff]  }
  0x27   : > { %777 = vmatpush1.bf16.msra.mxu0 %v2920_v29  ;;  %v2987_v29 = vld [vmem:[%s3840_s1 + $0xd4] ss:$24 sps:$4 sm:$0xff]  }
  0x28   : > { %2321 = vmatprep.subr.msk.bf16.mxu0 %vm741_vm1, %v2921_v30  ;;  %818 = vmatpush1.bf16.msra.mxu1 %v2950_v38  ;;  %v2985_v30 = vld [vmem:[%s3840_s1 + $0xd0] ss:$24 sps:$4 sm:$0xff]   ;;  %v2999_v38 = vld [vmem:[%s3840_s1 + $0x194] ss:$24 sps:$4 sm:$0xff]  }
  0x29   : > { %819 = vmatprep.subr.bf16.mxu1 %v2951_v40  ;;  %v3000_v40 = vld [vmem:[%s3840_s1 + $0x1c4] ss:$24 sps:$4 sm:$0x3f]  }
  0x2b   : > { %779 = vmatpush1.bf16.msra.mxu0 %v743_v28  ;;  %v2982_v28 = vld [vmem:[%s3840_s1 + $0xa0] ss:$24 sps:$4 sm:$0xff]  }
  0x2c   : > { %820 = vmatpush1.bf16.msra.mxu1 %v2953_v41  ;;  %846 = vmatprep.subr.bf16.mxu0 %v2975_v22  ;;  %v3002_v41 = vld [vmem:[%s3840_s1 + $0x1c0] ss:$24 sps:$4 sm:$0x3f]  }
  0x2d   : > { %2323 = vmatprep.subr.msk.bf16.mxu1 %vm741_vm1, %v2954_v42  ;;  %v755_v42 = vsel %vm741_vm1, %v3002_v41, 0 }
  0x2e   : > { %793 = vmatmul.mubr.bf16.vlgmr.msra.gmra.mrb[0].mxu0 %v3258_v35 }
  0x2f   : > { %2326 = vmatprep.mubr.msk.bf16.mxu0 %vm737_vm0, %v2924_v11  ;;  %847 = vmatpush1.bf16.msra.mxu0 %v2973_v21 }
  0x30   : > { %822 = vmatpush1.bf16.msra.mxu1 %v749_v43  ;;  %848 = vmatprep.subr.bf16.mxu0 %v2978_v23  ;;  %v3003_v43 = vld [vmem:[%s3842_s3 + $0x40] sm:$0xff]  }
  0x31   : > { %2664 = vmatprep.subr.bf16.mxu1 %v3083_v45 }
  0x33   : > { %836 = vmatmul.mubr.bf16.vlgmr.msra.gmra.mrb[0].mxu1 %v3258_v35  ;;  %849 = vmatpush1.bf16.msra.mxu0 %v2976_v24 }
  0x34   : > { %2665 = vmatpush3.bf16.msra.mxu1 %v2957_v44  ;;  %2680 = vmatprep.mubr.msk.bf16.mxu1 %vm3084_vm2, %v3083_v45  ;;  %v3004_v44 = vld [vmem:[%s3842_s3 + $0x48] sm:$0xff]  }
  0x35   : > { %2666 = vmatprep.subr.bf16.mxu1 %v3083_v45  ;;  %850 = vmatprep.subr.bf16.mxu0 %v2981_v25 }
  0x37   : > { %851 = vmatpush1.bf16.msra.mxu0 %v2979_v26 }
  0x38   : > { %2667 = vmatpush3.bf16.msra.mxu1 %v2958_v46  ;;  %852 = vmatprep.subr.bf16.mxu0 %v2984_v27  ;;  %v3005_v46 = vld [vmem:[%s3842_s3 + $0x50] sm:$0xff]  }
  0x39   : > { %2668 = vmatprep.subr.bf16.mxu1 %v3083_v45 }
  0x3b   : > { %853 = vmatpush1.bf16.msra.mxu0 %v2982_v28 }
  0x3c   : > { %2669 = vmatpush3.bf16.msra.mxu1 %v2959_v47  ;;  %854 = vmatprep.subr.bf16.mxu0 %v2987_v29  ;;  %v3007_v47 = vld [vmem:[%s3842_s3 + $0x60] sm:$0xff]  }
  0x3d   : > { %2670 = vmatprep.subr.bf16.mxu1 %v3083_v45 }
  0x3f   : > { %855 = vmatpush1.bf16.msra.mxu0 %v2985_v30 }
  0x40   : > { %2671 = vmatpush3.bf16.msra.mxu1 %v2960_v48  ;;  %856 = vmatprep.subr.bf16.mxu0 %v2990_v31  ;;  %v2327_v48 = vld [vmem:[%s3843_s4] ss:$0 sm:$0xff] }
  0x41   : > { %2672 = vmatprep.subr.bf16.mxu1 %v3083_v45 }
  0x43   : > { %857 = vmatpush1.bf16.msra.mxu0 %v2988_v32 }
  0x44   : > { %2673 = vmatpush3.bf16.msra.mxu1 %v2961_v49  ;;  %858 = vmatprep.subr.bf16.mxu0 %v2993_v33  ;;  %v3021_v33 = vld [vmem:[%s3842_s3 + $0x90] sm:$0xff]  }
  0x45   : > { %2674 = vmatprep.subr.bf16.mxu1 %v3083_v45 }
  0x47   : > { %859 = vmatpush1.bf16.msra.mxu0 %v2991_v34  ;;  %v3022_v34 = vld [vmem:[%s3842_s3 + $0x98] sm:$0xff]  }
  0x48   : > { %2675 = vmatpush3.bf16.msra.mxu1 %v2962_v50  ;;  %860 = vmatprep.subr.bf16.mxu0 %v2996_v36  ;;  %v3023_v36 = vld [vmem:[%s3842_s3 + $0xa0] sm:$0xff]  }
  0x49   : > { %2676 = vmatprep.subr.bf16.mxu1 %v3083_v45 }
  0x4b   : > { %861 = vmatpush1.bf16.msra.mxu0 %v2994_v37  ;;  %v2362_v37 = vld [vmem:[%s3843_s4 + $0x1] ss:$0 sm:$0xff] }
  0x4c   : > { %2677 = vmatpush3.bf16.msra.mxu1 %v2963_v51  ;;  %862 = vmatprep.subr.bf16.mxu0 %v2999_v38 }
  0x4d   : > { %2678 = vmatprep.subr.bf16.mxu1 %v3083_v45 }
  0x4f   : > { %863 = vmatpush1.bf16.msra.mxu0 %v2997_v39 }
  0x50   : > { %2679 = vmatpush3.bf16.msra.mxu1 %v2964_v52  ;;  %2325 = vmatprep.subr.msk.bf16.mxu0 %vm741_vm1, %v3000_v40 }
  0x51   : > { %2684 = vmatprep.subr.bf16.mxu1 %v3083_v45 }
  0x53   : > { %865 = vmatpush1.bf16.msra.mxu0 %v755_v42 }
  0x54   : > { %2704 = vmatprep.subr.bf16.mxu0 %v3083_v45 }
  0x56   : > { %879 = vmatmul.mubr.bf16.vlgmr.msra.gmra.mrb[4].mxu0 %v3258_v35  ;;  %v3006_v35 = vld [vmem:[%s3842_s3 + $0x58] sm:$0xff]  }
  0x57   : > { %2705 = vmatpush3.bf16.msra.mxu0 %v3003_v43  ;;  %2720 = vmatprep.mubr.msk.bf16.mxu0 %vm3084_vm2, %v3083_v45 }
  0x58   : > { %2706 = vmatprep.subr.bf16.mxu0 %v3083_v45 }
  0x5b   : > { %2707 = vmatpush3.bf16.msra.mxu0 %v3004_v44 }
  0x5c   : > { %2708 = vmatprep.subr.bf16.mxu0 %v3083_v45 }
  0x5f   : > { %2709 = vmatpush3.bf16.msra.mxu0 %v3005_v46 }
  0x60   : > { %2710 = vmatprep.subr.bf16.mxu0 %v3083_v45 }
  0x63   : > { %2711 = vmatpush3.bf16.msra.mxu0 %v3006_v35 }
  0x64   : > { %2712 = vmatprep.subr.bf16.mxu0 %v3083_v45 }
  0x67   : > { %2713 = vmatpush3.bf16.msra.mxu0 %v3007_v47  ;;  %v3024_v47 = vld [vmem:[%s3842_s3 + $0xa8] sm:$0xff]  }
  0x68   : > { %2714 = vmatprep.subr.bf16.mxu0 %v3083_v45 }
 0x101   : > { %v794_v60 = vpop.f32.mrb[0].mxu0 }
 0x102   : > { %v795_v61 = vadd.f32 %v794_v60, %v407_v58  ;;  %v796_v62 = vpop.f32.mrb[1].mxu0  ;;  %v3008_v60 = vld [vmem:[%s3842_s3 + $0x68] sm:$0xff]  }
 0x103   : > { %v797_v63 = vadd.f32 %v796_v62, %v411_v59  ;;  %v798_v0 = vpop.f32.mrb[2].mxu0  ;;  %2715 = vmatpush3.bf16.msra.mxu0 %v3008_v60  ;;  %v3010_v62 = vld [vmem:[%s3842_s3 + $0x78] sm:$0xff]  }
 0x104   : > { %v799_v1 = vadd.f32 %v798_v0, %v407_v58  ;;  %v800_v2 = vpop.f32.mrb[3].mxu0  ;;  %2716 = vmatprep.subr.bf16.mxu0 %v3083_v45  ;;  %v3012_v0 = vld [vmem:[%s3844_s5 + $0x48] sm:$0xff]  }
 0x105   : > { %v3332_v3 = vadd.f32 %v797_v63, %v795_v61  ;;  %v801_v4 = vadd.f32 %v800_v2, %v411_v59  ;;  %v3009_v61 = vld [vmem:[%s3842_s3 + $0x70] sm:$0xff]   ;;  %v3011_v63 = vld [vmem:[%s3844_s5 + $0x40] sm:$0xff]   ;;  %v3014_v2 = vld [vmem:[%s3844_s5 + $0x58] sm:$0xff]  }
 0x106   : > { %v3347_v11 = vpop.f32.mrb[0].mxu1 }
 0x107   : > { %v3334_v5 = vadd.f32 %v801_v4, %v799_v1  ;;  %v891_v6 = vmax.f32 %v3332_v3, 0.0  ;;  %v3349_v12 = vpop.f32.mrb[1].mxu1  ;;  %2717 = vmatpush3.bf16.msra.mxu0 %v3009_v61  ;;  %v3013_v1 = vld [vmem:[%s3844_s5 + $0x50] sm:$0xff]   ;;  %v3015_v4 = vld [vmem:[%s3844_s5 + $0x60] sm:$0xff]  }
 0x108   : > { %v3351_v13 = vpop.f32.mrb[2].mxu1  ;;  %2718 = vmatprep.subr.bf16.mxu0 %v3083_v45 }
 0x109   : > { %v892_v7 = vmax.f32 %v3334_v5, 0.0  ;;  %v3356_v15 = vpop.f32.mrb[3].mxu1 }
 0x10b   : > { %v893_v9 = vpack.c.bf16 %v892_v7, %v891_v6  ;;  %2719 = vmatpush3.bf16.msra.mxu0 %v3010_v62  ;;  %v3016_v6 = vld [vmem:[%s3844_s5 + $0x68] sm:$0xff]  }
 0x10c   : > { %2744 = vmatprep.subr.bf16.mxu0 %v3083_v45 }
 0x10d   : > { %2681 = vmatmul.mubr.bf16.vlgmr.msra.gmra.mrb[4].mxu1 %v893_v9 }
 0x10e   : > { %2685 = vmatpush3.bf16.msra.mxu1 %v2965_v8  ;;  %2700 = vmatprep.mubr.msk.bf16.mxu1 %vm3084_vm2, %v3083_v45 }
 0x10f   : > { %2686 = vmatprep.subr.bf16.mxu1 %v3083_v45 }
 0x112   : > { %2687 = vmatpush3.bf16.msra.mxu1 %v2966_v10 }
 0x113   : > { %2688 = vmatprep.subr.bf16.mxu1 %v3083_v45 }
 0x116   : > { %2689 = vmatpush3.bf16.msra.mxu1 %v2967_v14  ;;  %v414_v14 = vsub.s32 2, %v3321_v54 }
 0x117   : > { %2690 = vmatprep.subr.bf16.mxu1 %v3083_v45 }
 0x11a   : > { %2691 = vmatpush3.bf16.msra.mxu1 %v2968_v16  ;;  %v2336_v16 = vld [vmem:[%s3845_s6] ss:$0 sm:$0xff] }
 0x11b   : > { %2692 = vmatprep.subr.bf16.mxu1 %v3083_v45 }
 0x11e   : > { %2693 = vmatpush3.bf16.msra.mxu1 %v2969_v17  ;;  %v415_v17 = vrot.slane %v3327_v56, %v414_v14 }
 0x11f   : > { %2694 = vmatprep.subr.bf16.mxu1 %v3083_v45 }
 0x120   : > { %v838_v22 = vadd.f32 %v3347_v11, %v415_v17  ;;  %v842_v26 = vadd.f32 %v3351_v13, %v415_v17  ;;  %v3019_v11 = vld [vmem:[%s3842_s3 + $0x80] sm:$0xff]   ;;  %v3020_v13 = vld [vmem:[%s3842_s3 + $0x88] sm:$0xff]  }
 0x122   : > { %2695 = vmatpush3.bf16.msra.mxu1 %v2970_v18 }
 0x123   : > { %2696 = vmatprep.subr.bf16.mxu1 %v3083_v45 }
 0x126   : > { %2697 = vmatpush3.bf16.msra.mxu1 %v2971_v19 }
 0x127   : > { %2698 = vmatprep.subr.bf16.mxu1 %v3083_v45 }
 0x129   : > { %v3507_v7 = vpop.f32.mrb[4].mxu0 }
 0x12a   : > { %2699 = vmatpush3.bf16.msra.mxu1 %v2972_v20  ;;  %v3509_v8 = vpop.f32.mrb[5].mxu0 }
 0x12b   : > { %2724 = vmatprep.subr.bf16.mxu1 %v3083_v45  ;;  %v3511_v9 = vpop.f32.mrb[6].mxu0 }
 0x12c   : > { %v3513_v10 = vpop.f32.mrb[7].mxu0 }
 0x1e0   : > { %v999_v49 = vpop.f32.mrb[4].mxu1 }
 0x1e1   : > { %v1000_v50 = vadd.f32 %v2327_v48, %v999_v49  ;;  %v2682_v51 = vpop.f32.mrb[5].mxu1  ;;  %v3026_v49 = vld [vmem:[%s3842_s3 + $0xb8] sm:$0xff]  }
 0x1e2   : > { %v1002_v52 = vpop.f32.mrb[6].mxu1  ;;  %v3028_v51 = vld [vmem:[%s3844_s5 + $0x88] sm:$0xff]  }
 0x1e3   : > { %v1003_v53 = vadd.f32 %v2327_v48, %v1002_v52  ;;  %v2683_v55 = vpop.f32.mrb[7].mxu1  ;;  %v1006_v57 = vmax.f32 %v1000_v50, 0.0  ;;  %v3025_v48 = vld [vmem:[%s3842_s3 + $0xb0] sm:$0xff]   ;;  %v3027_v50 = vld [vmem:[%s3844_s5 + $0x80] sm:$0xff]  }
 0x1e4   : > { %v3029_v52 = vld [vmem:[%s3844_s5 + $0x90] sm:$0xff]   ;;  %v3031_v55 = vld [vmem:[%s3844_s5 + $0xa0] sm:$0xff]  }
 0x1e5   : > { %v1007_v58 = vmax.f32 %v1003_v53, 0.0  ;;  %v3030_v53 = vld [vmem:[%s3844_s5 + $0x98] sm:$0xff]  }
 0x1e7   : > { %v1008_v59 = vpack.c.bf16 %v1007_v58, %v1006_v57  ;;  %v3032_v57 = vld [vmem:[%s3844_s5 + $0xa8] sm:$0xff]   ;;  %v418_v58 = vsub.s32 3, %v3321_v54 }
 0x1e9   : > { %2701 = vmatmul.mubr.bf16.vlgmr.msra.gmra.mrb[8].mxu1 %v1008_v59  ;;  %v2388_v59 = vld [vmem:[%s3845_s6 + $0x1] ss:$0 sm:$0xff]  ;;  %v419_v60 = vrot.slane %v3327_v56, %v418_v58 }
 0x1ea   : > { %2740 = vmatprep.mubr.msk.bf16.mxu1 %vm3084_vm2, %v3083_v45  ;;  %2725 = vmatpush3.bf16.msra.mxu1 %v3011_v63 }
 0x1eb   : > { %2726 = vmatprep.subr.bf16.mxu1 %v3083_v45  ;;  %v844_v14 = vadd.f32 %v3356_v15, %v419_v60  ;;  %v3034_v15 = vld [vmem:[%s3844_s5 + $0xb8] sm:$0xff]  }
 0x1ee   : > { %2727 = vmatpush3.bf16.msra.mxu1 %v3012_v0 }
 0x1ef   : > { %2728 = vmatprep.subr.bf16.mxu1 %v3083_v45 }
 0x1f2   : > { %2729 = vmatpush3.bf16.msra.mxu1 %v3013_v1  ;;  %v840_v1 = vadd.f32 %v3349_v12, %v419_v60  ;;  %v3033_v12 = vld [vmem:[%s3844_s5 + $0xb0] sm:$0xff]  }
 0x1f3   : > { %2730 = vmatprep.subr.bf16.mxu1 %v3083_v45 }
 0x1f6   : > { %2731 = vmatpush3.bf16.msra.mxu1 %v3014_v2 }
 0x1f7   : > { %2732 = vmatprep.subr.bf16.mxu1 %v3083_v45 }
 0x1fa   : > { %2733 = vmatpush3.bf16.msra.mxu1 %v3015_v4 }
 0x1fb   : > { %2734 = vmatprep.subr.bf16.mxu1 %v3083_v45 }
 0x1fe   : > { %2735 = vmatpush3.bf16.msra.mxu1 %v3016_v6 }
 0x1ff   : > { %2736 = vmatprep.subr.bf16.mxu1 %v3083_v45 }
 0x2bc   : > { %v1114_v18 = vpop.f32.mrb[8].mxu1 }
 0x2bd   : > { %v1115_v19 = vadd.f32 %v2336_v16, %v1114_v18  ;;  %v2702_v20 = vpop.f32.mrb[9].mxu1 }
 0x2be   : > { %v1117_v21 = vpop.f32.mrb[10].mxu1 }
 0x2bf   : > { %v1121_v23 = vadd.f32 %v1115_v19, %v3332_v3  ;;  %v1118_v24 = vadd.f32 %v2336_v16, %v1117_v21  ;;  %v2703_v25 = vpop.f32.mrb[11].mxu1  ;;  %v3017_v3 = vld [vmem:[%s3844_s5 + $0x70] sm:$0xff]  }
 0x2c0   : > { %2737 = vmatpush3.bf16.msra.mxu1 %v3017_v3  ;;  %v3038_v25 = vld [vmem:[%s3842_s3 + $0xd8] sm:$0xff]  }
 0x2c1   : > { %v3523_v27 = vadd.f32 %v1121_v23, %v838_v22  ;;  %v1122_v28 = vadd.f32 %v1118_v24, %v3334_v5  ;;  %2738 = vmatprep.subr.bf16.mxu1 %v3083_v45  ;;  %v3018_v5 = vld [vmem:[%s3844_s5 + $0x78] sm:$0xff]   ;;  %v3035_v22 = vld [vmem:[%s3842_s3 + $0xc0] sm:$0xff]   ;;  %v3036_v23 = vld [vmem:[%s3842_s3 + $0xc8] sm:$0xff]  }
 0x2c2   : > { %v3037_v24 = vld [vmem:[%s3842_s3 + $0xd0] sm:$0xff]  }
 0x2c3   : > { %v3526_v29 = vadd.f32 %v1122_v28, %v842_v26  ;;  %v1125_v30 = vmax.f32 %v3523_v27, 0.0  ;;  %v3039_v26 = vld [vmem:[%s3842_s3 + $0xe0] sm:$0xff]  }
 0x2c4   : > { %2739 = vmatpush3.bf16.msra.mxu1 %v3018_v5 }
 0x2c5   : > { %v1126_v31 = vmax.f32 %v3526_v29, 0.0  ;;  %2764 = vmatprep.subr.bf16.mxu1 %v3083_v45 }
 0x2c7   : > { %v1127_v32 = vpack.c.bf16 %v1126_v31, %v1125_v30 }
 0x2c9   : > { %2721 = vmatmul.mubr.bf16.vlgmr.msra.gmra.mrb[8].mxu0 %v1127_v32 }
 0x2ca   : > { %2760 = vmatprep.mubr.msk.bf16.mxu0 %vm3084_vm2, %v3083_v45  ;;  %2745 = vmatpush3.bf16.msra.mxu0 %v3019_v11 }
 0x2cb   : > { %2746 = vmatprep.subr.bf16.mxu0 %v3083_v45 }
 0x2ce   : > { %2747 = vmatpush3.bf16.msra.mxu0 %v3020_v13 }
 0x2cf   : > { %2748 = vmatprep.subr.bf16.mxu0 %v3083_v45 }
 0x2d2   : > { %2749 = vmatpush3.bf16.msra.mxu0 %v3021_v33  ;;  %v3040_v33 = vld [vmem:[%s3842_s3 + $0xe8] sm:$0xff]  }
 0x2d3   : > { %2750 = vmatprep.subr.bf16.mxu0 %v3083_v45 }
 0x2d6   : > { %2751 = vmatpush3.bf16.msra.mxu0 %v3022_v34  ;;  %v3041_v34 = vld [vmem:[%s3842_s3 + $0xf0] sm:$0xff]  }
 0x2d7   : > { %2752 = vmatprep.subr.bf16.mxu0 %v3083_v45 }
 0x2da   : > { %2753 = vmatpush3.bf16.msra.mxu0 %v3023_v36  ;;  %v3042_v36 = vld [vmem:[%s3842_s3 + $0xf8] sm:$0xff]  }
 0x2db   : > { %2754 = vmatprep.subr.bf16.mxu0 %v3083_v45 }
 0x2de   : > { %2755 = vmatpush3.bf16.msra.mxu0 %v3024_v47 }
 0x2df   : > { %2756 = vmatprep.subr.bf16.mxu0 %v3083_v45 }
 0x2e2   : > { %2757 = vmatpush3.bf16.msra.mxu0 %v3025_v48 }
 0x2e3   : > { %2758 = vmatprep.subr.bf16.mxu0 %v3083_v45 }
 0x2e6   : > { %2759 = vmatpush3.bf16.msra.mxu0 %v3026_v49 }
 0x2e7   : > { %2784 = vmatprep.subr.bf16.mxu0 %v3083_v45 }
 0x39c   : > { %v1235_v38 = vpop.f32.mrb[8].mxu0 }
 0x39d   : > { %v1236_v39 = vadd.f32 %v2362_v37, %v1235_v38  ;;  %v2722_v40 = vpop.f32.mrb[9].mxu0  ;;  %v3044_v38 = vld [vmem:[%s3844_s5 + $0xc8] sm:$0xff]  }
 0x39e   : > { %v1238_v41 = vpop.f32.mrb[10].mxu0  ;;  %v3046_v40 = vld [vmem:[%s3844_s5 + $0xd8] sm:$0xff]  }
 0x39f   : > { %v1239_v42 = vadd.f32 %v2362_v37, %v1238_v41  ;;  %v2723_v43 = vpop.f32.mrb[11].mxu0  ;;  %v1242_v44 = vmax.f32 %v1236_v39, 0.0  ;;  %v3043_v37 = vld [vmem:[%s3844_s5 + $0xc0] sm:$0xff]   ;;  %v3045_v39 = vld [vmem:[%s3844_s5 + $0xd0] sm:$0xff]  }
 0x3a0   : > { %v3047_v41 = vld [vmem:[%s3844_s5 + $0xe0] sm:$0xff]   ;;  %v422_v43 = vsub.s32 4, %v3321_v54 }
 0x3a1   : > { %v1243_v46 = vmax.f32 %v1239_v42, 0.0  ;;  %v3048_v42 = vld [vmem:[%s3844_s5 + $0xe8] sm:$0xff]  }
 0x3a3   : > { %v1244_v35 = vpack.c.bf16 %v1243_v46, %v1242_v44  ;;  %v2440_v44 = vld [vmem:[%s3845_s6 + $0x2] ss:$0 sm:$0xff]  ;;  %v423_v46 = vrot.slane %v3327_v56, %v422_v43 }
 0x3a5   : > { %2741 = vmatmul.mubr.bf16.vlgmr.msra.gmra.mrb[12].mxu1 %v1244_v35 }
 0x3a6   : > { %2780 = vmatprep.mubr.msk.bf16.mxu1 %vm3084_vm2, %v3083_v45  ;;  %2765 = vmatpush3.bf16.msra.mxu1 %v3027_v50  ;;  %v881_v50 = vadd.f32 %v3507_v7, %v423_v46  ;;  %v3049_v7 = vld [vmem:[%s3844_s5 + $0xf0] sm:$0xff]  }
 0x3a7   : > { %2766 = vmatprep.subr.bf16.mxu1 %v3083_v45 }
 0x3aa   : > { %2767 = vmatpush3.bf16.msra.mxu1 %v3028_v51 }
 0x3ab   : > { %2768 = vmatprep.subr.bf16.mxu1 %v3083_v45 }
 0x3ae   : > { %2769 = vmatpush3.bf16.msra.mxu1 %v3029_v52 }
 0x3af   : > { %2770 = vmatprep.subr.bf16.mxu1 %v3083_v45 }
 0x3b2   : > { %2771 = vmatpush3.bf16.msra.mxu1 %v3030_v53 }
 0x3b3   : > { %2772 = vmatprep.subr.bf16.mxu1 %v3083_v45 }
 0x3b6   : > { %2773 = vmatpush3.bf16.msra.mxu1 %v3031_v55  ;;  %v885_v55 = vadd.f32 %v3511_v9, %v423_v46  ;;  %v3050_v9 = vld [vmem:[%s3844_s5 + $0xf8] sm:$0xff]   ;;  %v3068_v46 = vld [vmem:[%s3846_s7 + $0x8] sm:$0xff]  }
 0x3b7   : > { %2774 = vmatprep.subr.bf16.mxu1 %v3083_v45 }
 0x3ba   : > { %2775 = vmatpush3.bf16.msra.mxu1 %v3032_v57 }
 0x3bb   : > { %2776 = vmatprep.subr.bf16.mxu1 %v3083_v45 }
 0x3be   : > { %2777 = vmatpush3.bf16.msra.mxu1 %v3033_v12 }
 0x3bf   : > { %2778 = vmatprep.subr.bf16.mxu1 %v3083_v45 }
 0x3c2   : > { %2779 = vmatpush3.bf16.msra.mxu1 %v3034_v15 }
 0x3c3   : > { %2804 = vmatprep.subr.bf16.mxu1 %v3083_v45 }
 0x478   : > { %v1352_v61 = vpop.f32.mrb[12].mxu1 }
 0x479   : > { %v1353_v62 = vadd.f32 %v2388_v59, %v1352_v61  ;;  %v2742_v63 = vpop.f32.mrb[13].mxu1 }
 0x47a   : > { %v1355_v0 = vpop.f32.mrb[14].mxu1  ;;  %v3051_v63 = vld [vmem:[%s3842_s3 + $0x100] sm:$0xff]  }
 0x47b   : > { %v1359_v2 = vadd.f32 %v1353_v62, %v3523_v27  ;;  %v1356_v4 = vadd.f32 %v2388_v59, %v1355_v0  ;;  %v2743_v6 = vpop.f32.mrb[15].mxu1  ;;  %v2414_v27 = vld [vmem:[%s3843_s4 + $0x2] ss:$0 sm:$0xff]  ;;  %v3052_v0 = vld [vmem:[%s3842_s3 + $0x108] sm:$0xff]  }
 0x47c   : > { %v2466_v6 = vld [vmem:[%s3843_s4 + $0x3] ss:$0 sm:$0xff] }
 0x47d   : > { %v3609_v16 = vadd.f32 %v1359_v2, %v840_v1  ;;  %v1360_v17 = vadd.f32 %v1356_v4, %v3526_v29  ;;  %v3053_v1 = vld [vmem:[%s3842_s3 + $0x110] sm:$0xff]   ;;  %v3054_v2 = vld [vmem:[%s3842_s3 + $0x118] sm:$0xff]   ;;  %v3055_v4 = vld [vmem:[%s3842_s3 + $0x120] sm:$0xff]  }
 0x47f   : > { %v3612_v18 = vadd.f32 %v1360_v17, %v844_v14  ;;  %v1363_v19 = vmax.f32 %v3609_v16, 0.0 }
 0x481   : > { %v1364_v20 = vmax.f32 %v3612_v18, 0.0 }
 0x483   : > { %v1365_v21 = vpack.c.bf16 %v1364_v20, %v1363_v19 }
 0x485   : > { %2761 = vmatmul.mubr.bf16.vlgmr.msra.gmra.mrb[12].mxu0 %v1365_v21 }
 0x486   : > { %2800 = vmatprep.mubr.msk.bf16.mxu0 %vm3084_vm2, %v3083_v45  ;;  %2785 = vmatpush3.bf16.msra.mxu0 %v3035_v22  ;;  %v3056_v22 = vld [vmem:[%s3842_s3 + $0x128] sm:$0xff]  }
 0x487   : > { %2786 = vmatprep.subr.bf16.mxu0 %v3083_v45 }
 0x48a   : > { %2787 = vmatpush3.bf16.msra.mxu0 %v3036_v23  ;;  %v3057_v23 = vld [vmem:[%s3842_s3 + $0x130] sm:$0xff]  }
 0x48b   : > { %2788 = vmatprep.subr.bf16.mxu0 %v3083_v45 }
 0x48e   : > { %2789 = vmatpush3.bf16.msra.mxu0 %v3037_v24  ;;  %v3058_v24 = vld [vmem:[%s3842_s3 + $0x138] sm:$0xff]  }
 0x48f   : > { %2790 = vmatprep.subr.bf16.mxu0 %v3083_v45 }
 0x492   : > { %2791 = vmatpush3.bf16.msra.mxu0 %v3038_v25  ;;  %v3059_v25 = vld [vmem:[%s3844_s5 + $0x100] sm:$0xff]  }
 0x493   : > { %2792 = vmatprep.subr.bf16.mxu0 %v3083_v45 }
 0x496   : > { %2793 = vmatpush3.bf16.msra.mxu0 %v3039_v26  ;;  %v3060_v26 = vld [vmem:[%s3844_s5 + $0x108] sm:$0xff]  }
 0x497   : > { %2794 = vmatprep.subr.bf16.mxu0 %v3083_v45 }
 0x49a   : > { %2795 = vmatpush3.bf16.msra.mxu0 %v3040_v33 }
 0x49b   : > { %2796 = vmatprep.subr.bf16.mxu0 %v3083_v45 }
 0x49e   : > { %2797 = vmatpush3.bf16.msra.mxu0 %v3041_v34 }
 0x49f   : > { %2798 = vmatprep.subr.bf16.mxu0 %v3083_v45 }
 0x4a2   : > { %2799 = vmatpush3.bf16.msra.mxu0 %v3042_v36 }
 0x4a3   : > { %2824 = vmatprep.subr.bf16.mxu0 %v3083_v45 }
 0x558   : > { %v1473_v28 = vpop.f32.mrb[12].mxu0 }
 0x559   : > { %v1474_v29 = vadd.f32 %v2414_v27, %v1473_v28  ;;  %v2762_v30 = vpop.f32.mrb[13].mxu0  ;;  %v3062_v28 = vld [vmem:[%s3844_s5 + $0x118] sm:$0xff]  }
 0x55a   : > { %v1476_v31 = vpop.f32.mrb[14].mxu0  ;;  %v3064_v30 = vld [vmem:[%s3844_s5 + $0x128] sm:$0xff]  }
 0x55b   : > { %v1477_v32 = vadd.f32 %v2414_v27, %v1476_v31  ;;  %v2763_v3 = vpop.f32.mrb[15].mxu0  ;;  %v1480_v5 = vmax.f32 %v1474_v29, 0.0  ;;  %v3061_v27 = vld [vmem:[%s3844_s5 + $0x110] sm:$0xff]   ;;  %v3063_v29 = vld [vmem:[%s3844_s5 + $0x120] sm:$0xff]   ;;  %v426_v31 = vsub.s32 5, %v3321_v54 }
 0x55d   : > { %v1481_v11 = vmax.f32 %v1477_v32, 0.0  ;;  %v2492_v32 = vld [vmem:[%s3845_s6 + $0x3] ss:$0 sm:$0xff]  ;;  %v427_v3 = vrot.slane %v3327_v56, %v426_v31  ;;  %v3065_v56 = vld [vmem:[%s3844_s5 + $0x130] sm:$0xff]  }
 0x55f   : > { %v1482_v13 = vpack.c.bf16 %v1481_v11, %v1480_v5  ;;  %v883_v34 = vadd.f32 %v3509_v8, %v427_v3  ;;  %v3066_v8 = vld [vmem:[%s3844_s5 + $0x138] sm:$0xff]  }
 0x561   : > { %2781 = vmatmul.mubr.bf16.vlgmr.msra.gmra.mrb[16].mxu1 %v1482_v13 }
 0x562   : > { %2820 = vmatprep.mubr.msk.bf16.mxu1 %vm3084_vm2, %v3083_v45  ;;  %2805 = vmatpush3.bf16.msra.mxu1 %v3043_v37 }
 0x563   : > { %2806 = vmatprep.subr.bf16.mxu1 %v3083_v45 }
 0x566   : > { %2807 = vmatpush3.bf16.msra.mxu1 %v3044_v38 }
 0x567   : > { %2808 = vmatprep.subr.bf16.mxu1 %v3083_v45 }
 0x56a   : > { %2809 = vmatpush3.bf16.msra.mxu1 %v3045_v39  ;;  %v887_v39 = vadd.f32 %v3513_v10, %v427_v3  ;;  %v3067_v10 = vld [vmem:[%s3846_s7] sm:$0xff]  }
 0x56b   : > { %2810 = vmatprep.subr.bf16.mxu1 %v3083_v45 }
 0x56e   : > { %2811 = vmatpush3.bf16.msra.mxu1 %v3046_v40 }
 0x56f   : > { %2812 = vmatprep.subr.bf16.mxu1 %v3083_v45 }
 0x572   : > { %2813 = vmatpush3.bf16.msra.mxu1 %v3047_v41 }
 0x573   : > { %2814 = vmatprep.subr.bf16.mxu1 %v3083_v45 }
 0x576   : > { %2815 = vmatpush3.bf16.msra.mxu1 %v3048_v42 }
 0x577   : > { %2816 = vmatprep.subr.bf16.mxu1 %v3083_v45 }
 0x57a   : > { %2817 = vmatpush3.bf16.msra.mxu1 %v3049_v7  ;;  %v3074_v7 = vld [vmem:[%s3846_s7 + $0x38] sm:$0xff]  }
 0x57b   : > { %2818 = vmatprep.subr.bf16.mxu1 %v3083_v45 }
 0x57e   : > { %2819 = vmatpush3.bf16.msra.mxu1 %v3050_v9  ;;  %v2544_v9 = vld [vmem:[%s3845_s6 + $0x4] ss:$0 sm:$0xff] }
 0x57f   : > { %2844 = vmatprep.subr.bf16.mxu1 %v3083_v45 }
 0x634   : > { %v1590_v35 = vpop.f32.mrb[16].mxu1 }
 0x635   : > { %v1591_v47 = vadd.f32 %v2440_v44, %v1590_v35  ;;  %v2782_v48 = vpop.f32.mrb[17].mxu1  ;;  %v3069_v35 = vld [vmem:[%s3846_s7 + $0x10] sm:$0xff]  }
 0x636   : > { %v1593_v49 = vpop.f32.mrb[18].mxu1  ;;  %v3071_v48 = vld [vmem:[%s3846_s7 + $0x20] sm:$0xff]  }
 0x637   : > { %v1597_v51 = vadd.f32 %v1591_v47, %v3609_v16  ;;  %v1594_v52 = vadd.f32 %v2440_v44, %v1593_v49  ;;  %v2783_v53 = vpop.f32.mrb[19].mxu1  ;;  %v3070_v47 = vld [vmem:[%s3846_s7 + $0x18] sm:$0xff]   ;;  %v2518_v49 = vld [vmem:[%s3843_s4 + $0x4] ss:$0 sm:$0xff] }
 0x639   : > { %v3695_v57 = vadd.f32 %v1597_v51, %v881_v50  ;;  %v1598_v58 = vadd.f32 %v1594_v52, %v3612_v18 }
 0x63b   : > { %v3698_v59 = vadd.f32 %v1598_v58, %v885_v55  ;;  %v1601_v60 = vmax.f32 %v3695_v57, 0.0 }
 0x63d   : > { %v1602_v61 = vmax.f32 %v3698_v59, 0.0 }
 0x63f   : > { %v1603_v62 = vpack.c.bf16 %v1602_v61, %v1601_v60  ;;  %v3072_v61 = vld [vmem:[%s3846_s7 + $0x28] sm:$0xff]  }
 0x641   : > { %2801 = vmatmul.mubr.bf16.vlgmr.msra.gmra.mrb[16].mxu0 %v1603_v62  ;;  %v3073_v62 = vld [vmem:[%s3846_s7 + $0x30] sm:$0xff]  }
 0x642   : > { %2840 = vmatprep.mubr.msk.bf16.mxu0 %vm3084_vm2, %v3083_v45  ;;  %2825 = vmatpush3.bf16.msra.mxu0 %v3051_v63 }
 0x643   : > { %2826 = vmatprep.subr.bf16.mxu0 %v3083_v45 }
 0x646   : > { %2827 = vmatpush3.bf16.msra.mxu0 %v3052_v0 }
 0x647   : > { %2828 = vmatprep.subr.bf16.mxu0 %v3083_v45 }
 0x64a   : > { %2829 = vmatpush3.bf16.msra.mxu0 %v3053_v1 }
 0x64b   : > { %2830 = vmatprep.subr.bf16.mxu0 %v3083_v45 }
 0x64e   : > { %2831 = vmatpush3.bf16.msra.mxu0 %v3054_v2 }
 0x64f   : > { %2832 = vmatprep.subr.bf16.mxu0 %v3083_v45 }
 0x652   : > { %2833 = vmatpush3.bf16.msra.mxu0 %v3055_v4 }
 0x653   : > { %2834 = vmatprep.subr.bf16.mxu0 %v3083_v45 }
 0x656   : > { %2835 = vmatpush3.bf16.msra.mxu0 %v3056_v22 }
 0x657   : > { %2836 = vmatprep.subr.bf16.mxu0 %v3083_v45 }
 0x65a   : > { %2837 = vmatpush3.bf16.msra.mxu0 %v3057_v23 }
 0x65b   : > { %2838 = vmatprep.subr.bf16.mxu0 %v3083_v45 }
 0x65e   : > { %2839 = vmatpush3.bf16.msra.mxu0 %v3058_v24 }
 0x65f   : > { %2864 = vmatprep.subr.bf16.mxu0 %v3083_v45 }
 0x714   : > { %v1711_v14 = vpop.f32.mrb[16].mxu0 }
 0x715   : > { %v1712_v16 = vadd.f32 %v2466_v6, %v1711_v14  ;;  %v2802_v17 = vpop.f32.mrb[17].mxu0 }
 0x716   : > { %v1714_v18 = vpop.f32.mrb[18].mxu0 }
 0x717   : > { %v1715_v19 = vadd.f32 %v2466_v6, %v1714_v18  ;;  %v2803_v20 = vpop.f32.mrb[19].mxu0  ;;  %v1718_v21 = vmax.f32 %v1712_v16, 0.0 }
 0x719   : > { %v1719_v12 = vmax.f32 %v1715_v19, 0.0  ;;  %v2553_v19 = vld [vmem:[%s3847_s8] ss:$0 sm:$0xff] }
 0x71b   : > { %v1720_v15 = vpack.c.bf16 %v1719_v12, %v1718_v21 }
 0x71d   : > { %2821 = vmatmul.mubr.bf16.vlgmr.msra.gmra.mrb[20].mxu1 %v1720_v15 }
 0x71e   : > { %2860 = vmatprep.mubr.msk.bf16.mxu1 %vm3084_vm2, %v3083_v45  ;;  %2845 = vmatpush3.bf16.msra.mxu1 %v3059_v25 }
 0x71f   : > { %2846 = vmatprep.subr.bf16.mxu1 %v3083_v45 }
 0x722   : > { %2847 = vmatpush3.bf16.msra.mxu1 %v3060_v26 }
 0x723   : > { %2848 = vmatprep.subr.bf16.mxu1 %v3083_v45 }
 0x726   : > { %2849 = vmatpush3.bf16.msra.mxu1 %v3061_v27 }
 0x727   : > { %2850 = vmatprep.subr.bf16.mxu1 %v3083_v45 }
 0x72a   : > { %2851 = vmatpush3.bf16.msra.mxu1 %v3062_v28 }
 0x72b   : > { %2852 = vmatprep.subr.bf16.mxu1 %v3083_v45 }
 0x72e   : > { %2853 = vmatpush3.bf16.msra.mxu1 %v3063_v29 }
 0x72f   : > { %2854 = vmatprep.subr.bf16.mxu1 %v3083_v45 }
 0x732   : > { %2855 = vmatpush3.bf16.msra.mxu1 %v3064_v30 }
 0x733   : > { %2856 = vmatprep.subr.bf16.mxu1 %v3083_v45 }
 0x736   : > { %2857 = vmatpush3.bf16.msra.mxu1 %v3065_v56 }
 0x737   : > { %2858 = vmatprep.subr.bf16.mxu1 %v3083_v45 }
 0x73a   : > { %2859 = vmatpush3.bf16.msra.mxu1 %v3066_v8 }
 0x7f0   : > { %v1828_v5 = vpop.f32.mrb[20].mxu1 }
 0x7f1   : > { %v1829_v11 = vadd.f32 %v2492_v32, %v1828_v5  ;;  %v2822_v13 = vpop.f32.mrb[21].mxu1 }
 0x7f2   : > { %v1831_v33 = vpop.f32.mrb[22].mxu1 }
 0x7f3   : > { %v1835_v36 = vadd.f32 %v1829_v11, %v3695_v57  ;;  %v1832_v37 = vadd.f32 %v2492_v32, %v1831_v33  ;;  %v2823_v38 = vpop.f32.mrb[23].mxu1 }
 0x7f5   : > { %v1837_v40 = vadd.f32 %v1835_v36, %v883_v34  ;;  %v1836_v54 = vadd.f32 %v1832_v37, %v3698_v59 }
 0x7f7   : > { %v1838_v41 = vadd.f32 %v1836_v54, %v887_v39  ;;  %v1839_v42 = vmax.f32 %v1837_v40, 0.0 }
 0x7f9   : > { %v1840_v43 = vmax.f32 %v1838_v41, 0.0 }
 0x7fb   : > { %v1841_v44 = vpack.c.bf16 %v1840_v43, %v1839_v42 }
 0x7fd   : > { %2841 = vmatmul.mubr.bf16.vlgmr.msra.gmra.mrb[20].mxu0 %v1841_v44 }
 0x7fe   : > { %2880 = vmatprep.mubr.msk.bf16.mxu0 %vm3084_vm2, %v3083_v45  ;;  %2865 = vmatpush3.bf16.msra.mxu0 %v3067_v10 }
 0x7ff   : > { %2866 = vmatprep.subr.bf16.mxu0 %v3083_v45 }
 0x802   : > { %2867 = vmatpush3.bf16.msra.mxu0 %v3068_v46 }
 0x803   : > { %2868 = vmatprep.subr.bf16.mxu0 %v3083_v45 }
 0x806   : > { %2869 = vmatpush3.bf16.msra.mxu0 %v3069_v35 }
 0x807   : > { %2870 = vmatprep.subr.bf16.mxu0 %v3083_v45 }
 0x80a   : > { %2871 = vmatpush3.bf16.msra.mxu0 %v3070_v47 }
 0x80b   : > { %2872 = vmatprep.subr.bf16.mxu0 %v3083_v45 }
 0x80e   : > { %2873 = vmatpush3.bf16.msra.mxu0 %v3071_v48 }
 0x80f   : > { %2874 = vmatprep.subr.bf16.mxu0 %v3083_v45 }
 0x812   : > { %2875 = vmatpush3.bf16.msra.mxu0 %v3072_v61 }
 0x813   : > { %2876 = vmatprep.subr.bf16.mxu0 %v3083_v45 }
 0x816   : > { %2877 = vmatpush3.bf16.msra.mxu0 %v3073_v62 }
 0x817   : > { %2878 = vmatprep.subr.bf16.mxu0 %v3083_v45 }
 0x81a   : > { %2879 = vmatpush3.bf16.msra.mxu0 %v3074_v7 }
 0x8d0   : > { %v1949_v50 = vpop.f32.mrb[20].mxu0 }
 0x8d1   : > { %v1950_v51 = vadd.f32 %v2518_v49, %v1949_v50  ;;  %v2842_v52 = vpop.f32.mrb[21].mxu0 }
 0x8d2   : > { %v1952_v53 = vpop.f32.mrb[22].mxu0 }
 0x8d3   : > { %v1953_v55 = vadd.f32 %v2518_v49, %v1952_v53  ;;  %v2843_v57 = vpop.f32.mrb[23].mxu0  ;;  %v1956_v58 = vmax.f32 %v1950_v51, 0.0 }
 0x8d5   : > { %v1957_v59 = vmax.f32 %v1953_v55, 0.0 }
 0x8d7   : > { %v1958_v60 = vpack.c.bf16 %v1957_v59, %v1956_v58 }
 0x8d9   : > { %2861 = vmatmul.mubr.bf16.vlgmr.msra.gmra.mrb[24].mxu1 %v1958_v60 }
 0x9ac   : > { %v2066_v63 = vpop.f32.mrb[24].mxu1 }
 0x9ad   : > { %v2067_v0 = vadd.f32 %v2544_v9, %v2066_v63  ;;  %v2862_v1 = vpop.f32.mrb[25].mxu1 }
 0x9ae   : > { %v2069_v2 = vpop.f32.mrb[26].mxu1 }
 0x9af   : > { %v2073_v4 = vadd.f32 %v2067_v0, %v1837_v40  ;;  %v2070_v6 = vadd.f32 %v2544_v9, %v2069_v2  ;;  %v2863_v14 = vpop.f32.mrb[27].mxu1 }
 0x9b1   : > { %v2074_v16 = vadd.f32 %v2070_v6, %v1838_v41  ;;  %v2075_v17 = vmax.f32 %v2073_v4, 0.0 }
 0x9b3   : > { %v2076_v45 = vmax.f32 %v2074_v16, 0.0 }
 0x9b5   : > { %v2077_v18 = vpack.c.bf16 %v2076_v45, %v2075_v17 }
 0x9b7   : > { %2881 = vmatmul.mubr.bf16.vlgmr.msra.gmra.mrb[24].mxu0 %v2077_v18 }
 0xa8a   : > { %v2183_v20 = vpop.f32.mrb[24].mxu0 }
 0xa8b   : > { %v2184_v21 = vadd.f32 %v2553_v19, %v2183_v20  ;;  %v2882_v12 = vpop.f32.mrb[25].mxu0 }
 0xa8c   : > { %v2186_v15 = vpop.f32.mrb[26].mxu0 }
 0xa8d   : > { %2191 = vst.msk [vmem:[%s337_s16] sm:$0xff] %vm2190_vm3, %v2184_v21  ;;  %v2187_v22 = vadd.f32 %v2553_v19, %v2186_v15  ;;  %v2883_v23 = vpop.f32.mrb[27].mxu0 }
 0xa8f   : > { %2192 = vst.msk [vmem:[%s337_s16 + $0x8] sm:$0xff] %vm2190_vm3, %v2187_v22 }
 0xa90 PF: > { %s19_s30 = sadd.s32 1, %s3081_s30  }
 0xa91   : > { %p16_p4 = scmp.ge.s32.totalorder %s19_s30, 4  }
 0xa93   :  { %18 = sbr.rel (!%p16_p4) target bundleno = 1 (0x1), region = 102 }

</bundles_post_ra>
